<compile_context>
chip_gen: v7x
topology: tpu7x:2x2x1
jax: 0.10.0
libtpu: 0.0.40
codegen_flags: <defaults>
</compile_context>

<pallas_src>
import math
import functools

import jax
import jax.numpy as jnp
from jax.experimental import pallas as pl
from jax.experimental.pallas import tpu as pltpu

# ----------------------------- small ALBERT config ---------------------------
VOCAB_SIZE = 128
TYPE_VOCAB = 2
MAX_POS = 32
EMB = 16                 # factorized embedding size E (< hidden, as in ALBERT)
HIDDEN = 32
NUM_HEADS = 4
HEAD_DIM = HIDDEN // NUM_HEADS
FFN = 64
NUM_LAYERS = 4           # real albert-base-v2 has 12 unshared layers; shrunk
LN_EPS = 1e-12
MASK_NEG = -10000.0      # extended attention-mask fill value


# ----------------------------- in-kernel helpers ------------------------------

def _ln(x, g, b):
    """LayerNorm over the last dim, stats in f32. g/b broadcast from [1, H]."""
    mu = jnp.mean(x, axis=-1, keepdims=True)
    d = x - mu
    var = jnp.mean(d * d, axis=-1, keepdims=True)
    return d * jax.lax.rsqrt(var + LN_EPS) * g + b


def _gelu_new(x):
    """ALBERT 'gelu_new' (tanh approximation)."""
    c = math.sqrt(2.0 / math.pi)
    return 0.5 * x * (1.0 + jnp.tanh(c * (x + 0.044715 * x * x * x)))


# ----------------------------- fused encoder kernel ---------------------------

def _encoder_kernel(emb_ref, eg_ref, eb_ref, wmap_ref, bmap_ref, mask_ref,
                    wqkv_ref, bqkv_ref, wo_ref, bo_ref, ln1g_ref, ln1b_ref,
                    w1_ref, b1_ref, w2_ref, b2_ref, ln2g_ref, ln2b_ref,
                    out_ref, h_ref, ctx_ref, *, B, S, NH, D):
    """Grid axis = layer index. One full ALBERT layer per grid step.

    h_ref   : f32 [M, H] VMEM scratch, the residual stream carried across layers.
    ctx_ref : bf16 [M, H] VMEM scratch, per-head attention context assembly.
    """
    H = NH * D
    M = B * S
    l = pl.program_id(0)

    # ---- layer 0 only: fused embedding LayerNorm + embedding_hidden_mapping_in
    @pl.when(l == 0)
    def _():
        e = _ln(emb_ref[...].astype(jnp.float32), eg_ref[...], eb_ref[...])
        h_ref[...] = (jnp.dot(e.astype(jnp.bfloat16), wmap_ref[...],
                              preferred_element_type=jnp.float32) + bmap_ref[...])

    x = h_ref[...]                                   # [M, H] f32 residual stream
    xb = x.astype(jnp.bfloat16)

    # ---- fused Q|K|V projection (1/sqrt(D) pre-folded into the Q columns) ----
    qkv = (jnp.dot(xb, wqkv_ref[...], preferred_element_type=jnp.float32)
           + bqkv_ref[...])                          # [M, 3H] f32
    qkvb = qkv.astype(jnp.bfloat16)                  # cast once, slice many

    # additive key mask built in-kernel, hoisted out of the head loop: [B, 1, S]
    bias = ((1.0 - mask_ref[...].astype(jnp.float32)) * MASK_NEG)[:, None, :]

    # ---- attention: batched over B with 3-D einsums; per-head context written
    #      into ctx_ref so the output projection is one [M,H]@[H,H] matmul.
    for h in range(NH):
        q = qkvb[:, h * D:(h + 1) * D].reshape(B, S, D)
        k = qkvb[:, H + h * D:H + (h + 1) * D].reshape(B, S, D)
        v = qkvb[:, 2 * H + h * D:2 * H + (h + 1) * D].reshape(B, S, D)
        s = jnp.einsum('bqd,bkd->bqk', q, k,
                       preferred_element_type=jnp.float32) + bias     # [B,S,S] f32
        s = s - jnp.max(s, axis=-1, keepdims=True)
        p = jnp.exp(s)
        # approx EUP reciprocal (fast); use exact division for strict parity.
        p = p * pl.reciprocal(jnp.sum(p, axis=-1, keepdims=True), approx=True)
        ctx = jnp.einsum('bqk,bkd->bqd', p.astype(jnp.bfloat16), v,
                         preferred_element_type=jnp.float32)          # [B,S,D]
        ctx_ref[:, h * D:(h + 1) * D] = ctx.reshape(M, D).astype(jnp.bfloat16)

    # single output projection with full K = H depth; Wo stays bf16 (no upcast)
    attn = (jnp.dot(ctx_ref[...], wo_ref[...],
                    preferred_element_type=jnp.float32) + bo_ref[...])

    # ---- residual + LN1 ----
    h1 = _ln(x + attn, ln1g_ref[...], ln1b_ref[...])

    # ---- FFN (gelu_new) + residual + LN2 ----
    f = jnp.dot(h1.astype(jnp.bfloat16), w1_ref[...],
                preferred_element_type=jnp.float32) + b1_ref[...]
    f = _gelu_new(f)
    f = jnp.dot(f.astype(jnp.bfloat16), w2_ref[...],
                preferred_element_type=jnp.float32) + b2_ref[...]
    out = _ln(h1 + f, ln2g_ref[...], ln2b_ref[...])

    h_ref[...] = out                                 # carry residual stream (f32)
    out_ref[...] = out.astype(out_ref.dtype)         # per-layer bf16 slab


# ----------------------------- pallas_call wrapper -----------------------------

def albert_encoder(emb_flat, mask_f, params, *, B, S):
    """Runs embedding-mapping + all NUM_LAYERS layers in one pallas_call.

    Returns all per-layer hidden states stacked: [NUM_LAYERS, B*S, HIDDEN] bf16.
    """
    M, E = emb_flat.shape
    H, FF, L = HIDDEN, FFN, NUM_LAYERS
    lp = params["layers"]

    def fixed(shape):                      # layer-invariant input (kept resident)
        nd = len(shape)
        return pl.BlockSpec(shape, lambda l, nd=nd: (0,) * nd)

    def per_layer(shape):                  # stacked [L, ...] weight, streamed per layer
        nd = len(shape)
        return pl.BlockSpec((None,) + shape, lambda l, nd=nd: (l,) + (0,) * nd)

    kernel = functools.partial(_encoder_kernel, B=B, S=S, NH=NUM_HEADS, D=HEAD_DIM)

    return pl.pallas_call(
        kernel,
        out_shape=jax.ShapeDtypeStruct((L, M, H), jnp.bfloat16),
        grid=(L,),
        in_specs=[
            fixed((M, E)), fixed((1, E)), fixed((1, E)),
            fixed((E, H)), fixed((1, H)), fixed((B, S)),
            per_layer((H, 3 * H)), per_layer((1, 3 * H)),
            per_layer((H, H)), per_layer((1, H)),
            per_layer((1, H)), per_layer((1, H)),
            per_layer((H, FF)), per_layer((1, FF)),
            per_layer((FF, H)), per_layer((1, H)),
            per_layer((1, H)), per_layer((1, H)),
        ],
        out_specs=per_layer((M, H)),
        scratch_shapes=[pltpu.VMEM((M, H), jnp.float32),    # resident hidden state
                        pltpu.VMEM((M, H), jnp.bfloat16)],  # per-head ctx assembly
        compiler_params=pltpu.CompilerParams(
            dimension_semantics=("arbitrary",),              # layers are sequential
            vmem_limit_bytes=64 * 1024 * 1024),
    )(emb_flat,
      params["emb_ln_g"].reshape(1, E), params["emb_ln_b"].reshape(1, E),
      params["w_map"], params["b_map"].reshape(1, H), mask_f,
      lp["wqkv"], lp["bqkv"], lp["wo"], lp["bo"],
      lp["ln1_g"], lp["ln1_b"], lp["w1"], lp["b1"],
      lp["w2"], lp["b2"], lp["ln2_g"], lp["ln2_b"])


# ----------------------------- parameter init --------------------------------

def init_params(key):
    def wf(k, shape):
        return 0.02 * jax.random.normal(k, shape, jnp.float32)

    k = jax.random.split(key, 8)
    scale = 1.0 / math.sqrt(HEAD_DIM)

    # fused Q|K|V weight, stacked over (unshared) layers; fold 1/sqrt(D) into
    # the Q columns (Q bias is zero, so no bias scaling needed).
    wqkv = wf(k[4], (NUM_LAYERS, HIDDEN, 3 * HIDDEN))
    wqkv = wqkv.at[:, :, :HIDDEN].multiply(scale)

    params = {
        "word_emb": wf(k[0], (VOCAB_SIZE, EMB)),
        "pos_emb": wf(k[1], (MAX_POS, EMB)),
        "type_emb": wf(k[2], (TYPE_VOCAB, EMB)),
        "emb_ln_g": jnp.ones((EMB,), jnp.float32),
        "emb_ln_b": jnp.zeros((EMB,), jnp.float32),
        "w_map": wf(k[3], (EMB, HIDDEN)).astype(jnp.bfloat16),   # embedding_hidden_mapping_in
        "b_map": jnp.zeros((HIDDEN,), jnp.float32),
        "layers": {   # unshared per-layer weights, stacked on a leading L axis
            "wqkv": wqkv.astype(jnp.bfloat16),
            "bqkv": jnp.zeros((NUM_LAYERS, 1, 3 * HIDDEN), jnp.float32),
            "wo": wf(k[5], (NUM_LAYERS, HIDDEN, HIDDEN)).astype(jnp.bfloat16),
            "bo": jnp.zeros((NUM_LAYERS, 1, HIDDEN), jnp.float32),
            "ln1_g": jnp.ones((NUM_LAYERS, 1, HIDDEN), jnp.float32),
            "ln1_b": jnp.zeros((NUM_LAYERS, 1, HIDDEN), jnp.float32),
            "w1": wf(k[6], (NUM_LAYERS, HIDDEN, FFN)).astype(jnp.bfloat16),
            "b1": jnp.zeros((NUM_LAYERS, 1, FFN), jnp.float32),
            "w2": wf(k[7], (NUM_LAYERS, FFN, HIDDEN)).astype(jnp.bfloat16),
            "b2": jnp.zeros((NUM_LAYERS, 1, HIDDEN), jnp.float32),
            "ln2_g": jnp.ones((NUM_LAYERS, 1, HIDDEN), jnp.float32),
            "ln2_b": jnp.zeros((NUM_LAYERS, 1, HIDDEN), jnp.float32),
        },
    }
    return params


# ----------------------------- forward pass -----------------------------------

def albert_forward(params, input_ids, segs, mask):
    """Mirrors Albert_unshared_attn.forward: returns (last_hidden_state, all_layer)."""
    B, S = input_ids.shape
    M = B * S

    # embedding gathers stay in JAX glue (no clean Pallas equivalent besides per-row DMA)
    pos_ids = jnp.arange(S, dtype=jnp.int32)
    emb = (jnp.take(params["word_emb"], input_ids, axis=0)
           + jnp.take(params["pos_emb"], pos_ids, axis=0)[None, :, :]
           + jnp.take(params["type_emb"], segs, axis=0))            # [B, S, E]
    # TODO(synk): dropout omitted (deterministic eval-mode forward)

    all_h = albert_encoder(emb.reshape(M, EMB), mask.astype(jnp.float32),
                           params, B=B, S=S)                        # [L, B*S, H] bf16

    last_hidden = all_h[-1].reshape(B, S, HIDDEN)                   # output[0]
    all_layer = jnp.transpose(all_h.reshape(NUM_LAYERS, B, S, HIDDEN),
                              (1, 2, 0, 3))                         # [B, S, L, H]
    return last_hidden, all_layer


# ----------------------------- main -------------------------------------------

if __name__ == "__main__":
    B, S = 2, 8
    key = jax.random.PRNGKey(0)
    k_param, k_ids, k_segs = jax.random.split(key, 3)

    params = init_params(k_param)
    input_ids = jax.random.randint(k_ids, (B, S), 0, VOCAB_SIZE, dtype=jnp.int32)
    segs = jax.random.randint(k_segs, (B, S), 0, TYPE_VOCAB, dtype=jnp.int32)
    # attention mask: last two tokens of batch 1 are padding
    mask = jnp.ones((B, S), dtype=jnp.float32).at[1, -2:].set(0.0)

    last_hidden, all_layer = albert_forward(params, input_ids, segs, mask)
    last_hidden = jax.block_until_ready(last_hidden)
    all_layer = jax.block_until_ready(all_layer)

    assert last_hidden.shape == (B, S, HIDDEN)
    assert all_layer.shape == (B, S, NUM_LAYERS, HIDDEN)
    assert bool(jnp.all(jnp.isfinite(last_hidden.astype(jnp.float32))))
    assert bool(jnp.all(jnp.isfinite(all_layer.astype(jnp.float32))))
    print("KERNEL_OK")
</pallas_src>

<mosaic_0001>
module attributes {stable_mosaic.version = 11 : i64} {
  func.func @_encoder_kernel(%arg0: i32, %arg1: memref<16x16xf32, #tpu.memory_space<vmem>>, %arg2: memref<1x16xf32, #tpu.memory_space<vmem>>, %arg3: memref<1x16xf32, #tpu.memory_space<vmem>>, %arg4: memref<16x32xbf16, #tpu.memory_space<vmem>>, %arg5: memref<1x32xf32, #tpu.memory_space<vmem>>, %arg6: memref<2x8xf32, #tpu.memory_space<vmem>>, %arg7: memref<1x32x96xbf16, #tpu.memory_space<vmem>>, %arg8: memref<1x1x96xf32, #tpu.memory_space<vmem>>, %arg9: memref<1x32x32xbf16, #tpu.memory_space<vmem>>, %arg10: memref<1x1x32xf32, #tpu.memory_space<vmem>>, %arg11: memref<1x1x32xf32, #tpu.memory_space<vmem>>, %arg12: memref<1x1x32xf32, #tpu.memory_space<vmem>>, %arg13: memref<1x32x64xbf16, #tpu.memory_space<vmem>>, %arg14: memref<1x1x64xf32, #tpu.memory_space<vmem>>, %arg15: memref<1x64x32xbf16, #tpu.memory_space<vmem>>, %arg16: memref<1x1x32xf32, #tpu.memory_space<vmem>>, %arg17: memref<1x1x32xf32, #tpu.memory_space<vmem>>, %arg18: memref<1x1x32xf32, #tpu.memory_space<vmem>>, %arg19: memref<1x16x32xbf16, #tpu.memory_space<vmem>>, %arg20: memref<16x32xf32, #tpu.memory_space<vmem>>, %arg21: memref<16x32xbf16, #tpu.memory_space<vmem>>) attributes {dimension_semantics = [#tpu.dimension_semantics<arbitrary>], iteration_bounds = array<i64: 4>, scalar_prefetch = 0 : i64, scratch_operands = 2 : i64, tpu.core_type = #tpu.core_type<tc>, window_params = [{pipeline_mode = #tpu.pipeline_mode<synchronous>, transform_indices = @transform_0, window_bounds = array<i64: 16, 16>}, {pipeline_mode = #tpu.pipeline_mode<synchronous>, transform_indices = @transform_1, window_bounds = array<i64: 1, 16>}, {pipeline_mode = #tpu.pipeline_mode<synchronous>, transform_indices = @transform_2, window_bounds = array<i64: 1, 16>}, {pipeline_mode = #tpu.pipeline_mode<synchronous>, transform_indices = @transform_3, window_bounds = array<i64: 16, 32>}, {pipeline_mode = #tpu.pipeline_mode<synchronous>, transform_indices = @transform_4, window_bounds = array<i64: 1, 32>}, {pipeline_mode = #tpu.pipeline_mode<synchronous>, transform_indices = @transform_5, window_bounds = array<i64: 2, 8>}, {transform_indices = @transform_6, window_bounds = array<i64: 1, 32, 96>}, {transform_indices = @transform_7, window_bounds = array<i64: 1, 1, 96>}, {transform_indices = @transform_8, window_bounds = array<i64: 1, 32, 32>}, {transform_indices = @transform_9, window_bounds = array<i64: 1, 1, 32>}, {transform_indices = @transform_10, window_bounds = array<i64: 1, 1, 32>}, {transform_indices = @transform_11, window_bounds = array<i64: 1, 1, 32>}, {transform_indices = @transform_12, window_bounds = array<i64: 1, 32, 64>}, {transform_indices = @transform_13, window_bounds = array<i64: 1, 1, 64>}, {transform_indices = @transform_14, window_bounds = array<i64: 1, 64, 32>}, {transform_indices = @transform_15, window_bounds = array<i64: 1, 1, 32>}, {transform_indices = @transform_16, window_bounds = array<i64: 1, 1, 32>}, {transform_indices = @transform_17, window_bounds = array<i64: 1, 1, 32>}, {transform_indices = @transform_18, window_bounds = array<i64: 1, 16, 32>}]} {
    %c0_i32 = arith.constant 0 : i32
    %0 = arith.cmpi eq, %arg0, %c0_i32 : i32
    %1 = arith.extui %0 : i1 to i32
    %c0_i32_0 = arith.constant 0 : i32
    %2 = arith.cmpi ne, %1, %c0_i32_0 : i32
    scf.if %2 {
      %c0_87 = arith.constant 0 : index
      %c0_88 = arith.constant 0 : index
      %207 = vector.load %arg1[%c0_87, %c0_88] : memref<16x16xf32, #tpu.memory_space<vmem>>, vector<16x16xf32>
      %c0_89 = arith.constant 0 : index
      %c0_90 = arith.constant 0 : index
      %208 = vector.load %arg2[%c0_89, %c0_90] : memref<1x16xf32, #tpu.memory_space<vmem>>, vector<1x16xf32>
      %c0_91 = arith.constant 0 : index
      %c0_92 = arith.constant 0 : index
      %209 = vector.load %arg3[%c0_91, %c0_92] : memref<1x16xf32, #tpu.memory_space<vmem>>, vector<1x16xf32>
      %cst_93 = arith.constant dense<0.000000e+00> : vector<16xf32>
      %210 = vector.multi_reduction <add>, %207, %cst_93 [1] : vector<16x16xf32> to vector<16xf32>
      %211 = vector.shape_cast %210 : vector<16xf32> to vector<16x1xf32>
      %cst_94 = arith.constant 1.600000e+01 : f32
      %212 = vector.broadcast %cst_94 : f32 to vector<16x1xf32>
      %213 = arith.divf %211, %212 : vector<16x1xf32>
      %214 = vector.broadcast %213 : vector<16x1xf32> to vector<16x16xf32>
      %215 = arith.subf %207, %214 : vector<16x16xf32>
      %216 = arith.mulf %215, %215 : vector<16x16xf32>
      %cst_95 = arith.constant dense<0.000000e+00> : vector<16xf32>
      %217 = vector.multi_reduction <add>, %216, %cst_95 [1] : vector<16x16xf32> to vector<16xf32>
      %218 = vector.shape_cast %217 : vector<16xf32> to vector<16x1xf32>
      %cst_96 = arith.constant 1.600000e+01 : f32
      %219 = vector.broadcast %cst_96 : f32 to vector<16x1xf32>
      %220 = arith.divf %218, %219 : vector<16x1xf32>
      %cst_97 = arith.constant 9.99999996E-13 : f32
      %221 = vector.broadcast %cst_97 : f32 to vector<16x1xf32>
      %222 = arith.addf %220, %221 : vector<16x1xf32>
      %223 = math.rsqrt %222 : vector<16x1xf32>
      %224 = vector.broadcast %223 : vector<16x1xf32> to vector<16x16xf32>
      %225 = arith.mulf %215, %224 : vector<16x16xf32>
      %226 = vector.broadcast %208 : vector<1x16xf32> to vector<16x16xf32>
      %227 = arith.mulf %225, %226 : vector<16x16xf32>
      %228 = vector.broadcast %209 : vector<1x16xf32> to vector<16x16xf32>
      %229 = arith.addf %227, %228 : vector<16x16xf32>
      %230 = arith.truncf %229 : vector<16x16xf32> to vector<16x16xbf16>
      %c0_98 = arith.constant 0 : index
      %c0_99 = arith.constant 0 : index
      %231 = vector.load %arg4[%c0_98, %c0_99] : memref<16x32xbf16, #tpu.memory_space<vmem>>, vector<16x32xbf16>
      %cst_100 = arith.constant dense<0.000000e+00> : vector<16x32xf32>
      %232 = tpu.matmul %230, %231, %cst_100 {dimension_numbers = #tpu.dot_dimension_numbers<[1], [0], [0], [1], [0, 0, 1, 1], [], []>} : vector<16x16xbf16>, vector<16x32xbf16>, vector<16x32xf32> -> vector<16x32xf32>
      %c0_101 = arith.constant 0 : index
      %c0_102 = arith.constant 0 : index
      %233 = vector.load %arg5[%c0_101, %c0_102] : memref<1x32xf32, #tpu.memory_space<vmem>>, vector<1x32xf32>
      %234 = vector.broadcast %233 : vector<1x32xf32> to vector<16x32xf32>
      %235 = arith.addf %232, %234 : vector<16x32xf32>
      %c0_103 = arith.constant 0 : index
      %c0_104 = arith.constant 0 : index
      %236 = vector.load %arg20[%c0_103, %c0_104] : memref<16x32xf32, #tpu.memory_space<vmem>>, vector<16x32xf32>
      tpu.vector_store %arg20[%c0_103, %c0_104], %235 {strides = array<i32>} : memref<16x32xf32, #tpu.memory_space<vmem>>, vector<16x32xf32>,
    } else {
    }
    %c0 = arith.constant 0 : index
    %c0_1 = arith.constant 0 : index
    %3 = vector.load %arg20[%c0, %c0_1] : memref<16x32xf32, #tpu.memory_space<vmem>>, vector<16x32xf32>
    %4 = arith.truncf %3 : vector<16x32xf32> to vector<16x32xbf16>
    %c0_2 = arith.constant 0 : index
    %c0_3 = arith.constant 0 : index
    %c0_4 = arith.constant 0 : index
    %5 = vector.load %arg7[%c0_2, %c0_3, %c0_4] : memref<1x32x96xbf16, #tpu.memory_space<vmem>>, vector<1x32x96xbf16>
    %6 = vector.shape_cast %5 : vector<1x32x96xbf16> to vector<32x96xbf16>
    %cst = arith.constant dense<0.000000e+00> : vector<16x96xf32>
    %7 = tpu.matmul %4, %6, %cst {dimension_numbers = #tpu.dot_dimension_numbers<[1], [0], [0], [1], [0, 0, 1, 1], [], []>} : vector<16x32xbf16>, vector<32x96xbf16>, vector<16x96xf32> -> vector<16x96xf32>
    %c0_5 = arith.constant 0 : index
    %c0_6 = arith.constant 0 : index
    %c0_7 = arith.constant 0 : index
    %8 = vector.load %arg8[%c0_5, %c0_6, %c0_7] : memref<1x1x96xf32, #tpu.memory_space<vmem>>, vector<1x1x96xf32>
    %9 = vector.shape_cast %8 : vector<1x1x96xf32> to vector<1x96xf32>
    %10 = vector.broadcast %9 : vector<1x96xf32> to vector<16x96xf32>
    %11 = arith.addf %7, %10 : vector<16x96xf32>
    %12 = arith.truncf %11 : vector<16x96xf32> to vector<16x96xbf16>
    %c0_8 = arith.constant 0 : index
    %c0_9 = arith.constant 0 : index
    %13 = vector.load %arg6[%c0_8, %c0_9] : memref<2x8xf32, #tpu.memory_space<vmem>>, vector<2x8xf32>
    %cst_10 = arith.constant 1.000000e+00 : f32
    %14 = vector.broadcast %cst_10 : f32 to vector<2x8xf32>
    %15 = arith.subf %14, %13 : vector<2x8xf32>
    %cst_11 = arith.constant -1.000000e+04 : f32
    %16 = vector.broadcast %cst_11 : f32 to vector<2x8xf32>
    %17 = arith.mulf %15, %16 : vector<2x8xf32>
    %18 = vector.shape_cast %17 : vector<2x8xf32> to vector<2x1x8xf32>
    %19 = vector.extract_strided_slice %12 {offsets = [0, 0], sizes = [16, 8], strides = [1, 1]} : vector<16x96xbf16> to vector<16x8xbf16>
    %20 = vector.shape_cast %19 : vector<16x8xbf16> to vector<2x8x8xbf16>
    %21 = vector.extract_strided_slice %12 {offsets = [0, 32], sizes = [16, 8], strides = [1, 1]} : vector<16x96xbf16> to vector<16x8xbf16>
    %22 = vector.shape_cast %21 : vector<16x8xbf16> to vector<2x8x8xbf16>
    %23 = vector.extract_strided_slice %12 {offsets = [0, 64], sizes = [16, 8], strides = [1, 1]} : vector<16x96xbf16> to vector<16x8xbf16>
    %24 = vector.shape_cast %23 : vector<16x8xbf16> to vector<2x8x8xbf16>
    "tpu.trace_start"() <{level = 10 : i32, message = "bqd,bkd->bqk"}> : () -> ()
    %cst_12 = arith.constant dense<0.000000e+00> : vector<2x8x8xf32>
    %25 = tpu.matmul %20, %22, %cst_12 {dimension_numbers = #tpu.dot_dimension_numbers<[2], [2], [1], [1], [0, 0, 0, 1, 1, 1], [0], [0]>} : vector<2x8x8xbf16>, vector<2x8x8xbf16>, vector<2x8x8xf32> -> vector<2x8x8xf32>
    "tpu.trace_stop"() : () -> ()
    %26 = vector.broadcast %18 : vector<2x1x8xf32> to vector<2x8x8xf32>
    %27 = arith.addf %25, %26 : vector<2x8x8xf32>
    %cst_13 = arith.constant dense<0xFF800000> : vector<2x8xf32>
    %28 = vector.multi_reduction <maximumf>, %27, %cst_13 [2] : vector<2x8x8xf32> to vector<2x8xf32>
    %29 = vector.shape_cast %28 : vector<2x8xf32> to vector<2x8x1xf32>
    %30 = vector.broadcast %29 : vector<2x8x1xf32> to vector<2x8x8xf32>
    %31 = arith.subf %27, %30 : vector<2x8x8xf32>
    %32 = math.exp %31 : vector<2x8x8xf32>
    %cst_14 = arith.constant dense<0.000000e+00> : vector<2x8xf32>
    %33 = vector.multi_reduction <add>, %32, %cst_14 [2] : vector<2x8x8xf32> to vector<2x8xf32>
    %34 = vector.shape_cast %33 : vector<2x8xf32> to vector<2x8x1xf32>
    %35 = tpu.reciprocal %34 {approx = true} : vector<2x8x1xf32> -> vector<2x8x1xf32>
    %36 = vector.broadcast %35 : vector<2x8x1xf32> to vector<2x8x8xf32>
    %37 = arith.mulf %32, %36 : vector<2x8x8xf32>
    %38 = arith.truncf %37 : vector<2x8x8xf32> to vector<2x8x8xbf16>
    "tpu.trace_start"() <{level = 10 : i32, message = "bqk,bkd->bqd"}> : () -> ()
    %cst_15 = arith.constant dense<0.000000e+00> : vector<2x8x8xf32>
    %39 = tpu.matmul %38, %24, %cst_15 {dimension_numbers = #tpu.dot_dimension_numbers<[2], [1], [1], [2], [0, 0, 0, 1, 1, 2], [0], [0]>} : vector<2x8x8xbf16>, vector<2x8x8xbf16>, vector<2x8x8xf32> -> vector<2x8x8xf32>
    "tpu.trace_stop"() : () -> ()
    %40 = vector.shape_cast %39 : vector<2x8x8xf32> to vector<16x8xf32>
    %41 = arith.truncf %40 : vector<16x8xf32> to vector<16x8xbf16>
    %c0_16 = arith.constant 0 : index
    %c0_17 = arith.constant 0 : index
    %42 = vector.load %arg21[%c0_16, %c0_17] : memref<16x32xbf16, #tpu.memory_space<vmem>>, vector<16x8xbf16>
    tpu.vector_store %arg21[%c0_16, %c0_17], %41 {strides = array<i32>} : memref<16x32xbf16, #tpu.memory_space<vmem>>, vector<16x8xbf16>,
    %43 = vector.extract_strided_slice %12 {offsets = [0, 8], sizes = [16, 8], strides = [1, 1]} : vector<16x96xbf16> to vector<16x8xbf16>
    %44 = vector.shape_cast %43 : vector<16x8xbf16> to vector<2x8x8xbf16>
    %45 = vector.extract_strided_slice %12 {offsets = [0, 40], sizes = [16, 8], strides = [1, 1]} : vector<16x96xbf16> to vector<16x8xbf16>
    %46 = vector.shape_cast %45 : vector<16x8xbf16> to vector<2x8x8xbf16>
    %47 = vector.extract_strided_slice %12 {offsets = [0, 72], sizes = [16, 8], strides = [1, 1]} : vector<16x96xbf16> to vector<16x8xbf16>
    %48 = vector.shape_cast %47 : vector<16x8xbf16> to vector<2x8x8xbf16>
    "tpu.trace_start"() <{level = 10 : i32, message = "bqd,bkd->bqk"}> : () -> ()
    %cst_18 = arith.constant dense<0.000000e+00> : vector<2x8x8xf32>
    %49 = tpu.matmul %44, %46, %cst_18 {dimension_numbers = #tpu.dot_dimension_numbers<[2], [2], [1], [1], [0, 0, 0, 1, 1, 1], [0], [0]>} : vector<2x8x8xbf16>, vector<2x8x8xbf16>, vector<2x8x8xf32> -> vector<2x8x8xf32>
    "tpu.trace_stop"() : () -> ()
    %50 = vector.broadcast %18 : vector<2x1x8xf32> to vector<2x8x8xf32>
    %51 = arith.addf %49, %50 : vector<2x8x8xf32>
    %cst_19 = arith.constant dense<0xFF800000> : vector<2x8xf32>
    %52 = vector.multi_reduction <maximumf>, %51, %cst_19 [2] : vector<2x8x8xf32> to vector<2x8xf32>
    %53 = vector.shape_cast %52 : vector<2x8xf32> to vector<2x8x1xf32>
    %54 = vector.broadcast %53 : vector<2x8x1xf32> to vector<2x8x8xf32>
    %55 = arith.subf %51, %54 : vector<2x8x8xf32>
    %56 = math.exp %55 : vector<2x8x8xf32>
    %cst_20 = arith.constant dense<0.000000e+00> : vector<2x8xf32>
    %57 = vector.multi_reduction <add>, %56, %cst_20 [2] : vector<2x8x8xf32> to vector<2x8xf32>
    %58 = vector.shape_cast %57 : vector<2x8xf32> to vector<2x8x1xf32>
    %59 = tpu.reciprocal %58 {approx = true} : vector<2x8x1xf32> -> vector<2x8x1xf32>
    %60 = vector.broadcast %59 : vector<2x8x1xf32> to vector<2x8x8xf32>
    %61 = arith.mulf %56, %60 : vector<2x8x8xf32>
    %62 = arith.truncf %61 : vector<2x8x8xf32> to vector<2x8x8xbf16>
    "tpu.trace_start"() <{level = 10 : i32, message = "bqk,bkd->bqd"}> : () -> ()
    %cst_21 = arith.constant dense<0.000000e+00> : vector<2x8x8xf32>
    %63 = tpu.matmul %62, %48, %cst_21 {dimension_numbers = #tpu.dot_dimension_numbers<[2], [1], [1], [2], [0, 0, 0, 1, 1, 2], [0], [0]>} : vector<2x8x8xbf16>, vector<2x8x8xbf16>, vector<2x8x8xf32> -> vector<2x8x8xf32>
    "tpu.trace_stop"() : () -> ()
    %64 = vector.shape_cast %63 : vector<2x8x8xf32> to vector<16x8xf32>
    %65 = arith.truncf %64 : vector<16x8xf32> to vector<16x8xbf16>
    %c0_22 = arith.constant 0 : index
    %c8 = arith.constant 8 : index
    %66 = vector.load %arg21[%c0_22, %c8] : memref<16x32xbf16, #tpu.memory_space<vmem>>, vector<16x8xbf16>
    tpu.vector_store %arg21[%c0_22, %c8], %65 {strides = array<i32>} : memref<16x32xbf16, #tpu.memory_space<vmem>>, vector<16x8xbf16>,
    %67 = vector.extract_strided_slice %12 {offsets = [0, 16], sizes = [16, 8], strides = [1, 1]} : vector<16x96xbf16> to vector<16x8xbf16>
    %68 = vector.shape_cast %67 : vector<16x8xbf16> to vector<2x8x8xbf16>
    %69 = vector.extract_strided_slice %12 {offsets = [0, 48], sizes = [16, 8], strides = [1, 1]} : vector<16x96xbf16> to vector<16x8xbf16>
    %70 = vector.shape_cast %69 : vector<16x8xbf16> to vector<2x8x8xbf16>
    %71 = vector.extract_strided_slice %12 {offsets = [0, 80], sizes = [16, 8], strides = [1, 1]} : vector<16x96xbf16> to vector<16x8xbf16>
    %72 = vector.shape_cast %71 : vector<16x8xbf16> to vector<2x8x8xbf16>
    "tpu.trace_start"() <{level = 10 : i32, message = "bqd,bkd->bqk"}> : () -> ()
    %cst_23 = arith.constant dense<0.000000e+00> : vector<2x8x8xf32>
    %73 = tpu.matmul %68, %70, %cst_23 {dimension_numbers = #tpu.dot_dimension_numbers<[2], [2], [1], [1], [0, 0, 0, 1, 1, 1], [0], [0]>} : vector<2x8x8xbf16>, vector<2x8x8xbf16>, vector<2x8x8xf32> -> vector<2x8x8xf32>
    "tpu.trace_stop"() : () -> ()
    %74 = vector.broadcast %18 : vector<2x1x8xf32> to vector<2x8x8xf32>
    %75 = arith.addf %73, %74 : vector<2x8x8xf32>
    %cst_24 = arith.constant dense<0xFF800000> : vector<2x8xf32>
    %76 = vector.multi_reduction <maximumf>, %75, %cst_24 [2] : vector<2x8x8xf32> to vector<2x8xf32>
    %77 = vector.shape_cast %76 : vector<2x8xf32> to vector<2x8x1xf32>
    %78 = vector.broadcast %77 : vector<2x8x1xf32> to vector<2x8x8xf32>
    %79 = arith.subf %75, %78 : vector<2x8x8xf32>
    %80 = math.exp %79 : vector<2x8x8xf32>
    %cst_25 = arith.constant dense<0.000000e+00> : vector<2x8xf32>
    %81 = vector.multi_reduction <add>, %80, %cst_25 [2] : vector<2x8x8xf32> to vector<2x8xf32>
    %82 = vector.shape_cast %81 : vector<2x8xf32> to vector<2x8x1xf32>
    %83 = tpu.reciprocal %82 {approx = true} : vector<2x8x1xf32> -> vector<2x8x1xf32>
    %84 = vector.broadcast %83 : vector<2x8x1xf32> to vector<2x8x8xf32>
    %85 = arith.mulf %80, %84 : vector<2x8x8xf32>
    %86 = arith.truncf %85 : vector<2x8x8xf32> to vector<2x8x8xbf16>
    "tpu.trace_start"() <{level = 10 : i32, message = "bqk,bkd->bqd"}> : () -> ()
    %cst_26 = arith.constant dense<0.000000e+00> : vector<2x8x8xf32>
    %87 = tpu.matmul %86, %72, %cst_26 {dimension_numbers = #tpu.dot_dimension_numbers<[2], [1], [1], [2], [0, 0, 0, 1, 1, 2], [0], [0]>} : vector<2x8x8xbf16>, vector<2x8x8xbf16>, vector<2x8x8xf32> -> vector<2x8x8xf32>
    "tpu.trace_stop"() : () -> ()
    %88 = vector.shape_cast %87 : vector<2x8x8xf32> to vector<16x8xf32>
    %89 = arith.truncf %88 : vector<16x8xf32> to vector<16x8xbf16>
    %c0_27 = arith.constant 0 : index
    %c16 = arith.constant 16 : index
    %90 = vector.load %arg21[%c0_27, %c16] : memref<16x32xbf16, #tpu.memory_space<vmem>>, vector<16x8xbf16>
    tpu.vector_store %arg21[%c0_27, %c16], %89 {strides = array<i32>} : memref<16x32xbf16, #tpu.memory_space<vmem>>, vector<16x8xbf16>,
    %91 = vector.extract_strided_slice %12 {offsets = [0, 24], sizes = [16, 8], strides = [1, 1]} : vector<16x96xbf16> to vector<16x8xbf16>
    %92 = vector.shape_cast %91 : vector<16x8xbf16> to vector<2x8x8xbf16>
    %93 = vector.extract_strided_slice %12 {offsets = [0, 56], sizes = [16, 8], strides = [1, 1]} : vector<16x96xbf16> to vector<16x8xbf16>
    %94 = vector.shape_cast %93 : vector<16x8xbf16> to vector<2x8x8xbf16>
    %95 = vector.extract_strided_slice %12 {offsets = [0, 88], sizes = [16, 8], strides = [1, 1]} : vector<16x96xbf16> to vector<16x8xbf16>
    %96 = vector.shape_cast %95 : vector<16x8xbf16> to vector<2x8x8xbf16>
    "tpu.trace_start"() <{level = 10 : i32, message = "bqd,bkd->bqk"}> : () -> ()
    %cst_28 = arith.constant dense<0.000000e+00> : vector<2x8x8xf32>
    %97 = tpu.matmul %92, %94, %cst_28 {dimension_numbers = #tpu.dot_dimension_numbers<[2], [2], [1], [1], [0, 0, 0, 1, 1, 1], [0], [0]>} : vector<2x8x8xbf16>, vector<2x8x8xbf16>, vector<2x8x8xf32> -> vector<2x8x8xf32>
    "tpu.trace_stop"() : () -> ()
    %98 = vector.broadcast %18 : vector<2x1x8xf32> to vector<2x8x8xf32>
    %99 = arith.addf %97, %98 : vector<2x8x8xf32>
    %cst_29 = arith.constant dense<0xFF800000> : vector<2x8xf32>
    %100 = vector.multi_reduction <maximumf>, %99, %cst_29 [2] : vector<2x8x8xf32> to vector<2x8xf32>
    %101 = vector.shape_cast %100 : vector<2x8xf32> to vector<2x8x1xf32>
    %102 = vector.broadcast %101 : vector<2x8x1xf32> to vector<2x8x8xf32>
    %103 = arith.subf %99, %102 : vector<2x8x8xf32>
    %104 = math.exp %103 : vector<2x8x8xf32>
    %cst_30 = arith.constant dense<0.000000e+00> : vector<2x8xf32>
    %105 = vector.multi_reduction <add>, %104, %cst_30 [2] : vector<2x8x8xf32> to vector<2x8xf32>
    %106 = vector.shape_cast %105 : vector<2x8xf32> to vector<2x8x1xf32>
    %107 = tpu.reciprocal %106 {approx = true} : vector<2x8x1xf32> -> vector<2x8x1xf32>
    %108 = vector.broadcast %107 : vector<2x8x1xf32> to vector<2x8x8xf32>
    %109 = arith.mulf %104, %108 : vector<2x8x8xf32>
    %110 = arith.truncf %109 : vector<2x8x8xf32> to vector<2x8x8xbf16>
    "tpu.trace_start"() <{level = 10 : i32, message = "bqk,bkd->bqd"}> : () -> ()
    %cst_31 = arith.constant dense<0.000000e+00> : vector<2x8x8xf32>
    %111 = tpu.matmul %110, %96, %cst_31 {dimension_numbers = #tpu.dot_dimension_numbers<[2], [1], [1], [2], [0, 0, 0, 1, 1, 2], [0], [0]>} : vector<2x8x8xbf16>, vector<2x8x8xbf16>, vector<2x8x8xf32> -> vector<2x8x8xf32>
    "tpu.trace_stop"() : () -> ()
    %112 = vector.shape_cast %111 : vector<2x8x8xf32> to vector<16x8xf32>
    %113 = arith.truncf %112 : vector<16x8xf32> to vector<16x8xbf16>
    %c0_32 = arith.constant 0 : index
    %c24 = arith.constant 24 : index
    %114 = vector.load %arg21[%c0_32, %c24] : memref<16x32xbf16, #tpu.memory_space<vmem>>, vector<16x8xbf16>
    tpu.vector_store %arg21[%c0_32, %c24], %113 {strides = array<i32>} : memref<16x32xbf16, #tpu.memory_space<vmem>>, vector<16x8xbf16>,
    %c0_33 = arith.constant 0 : index
    %c0_34 = arith.constant 0 : index
    %115 = vector.load %arg21[%c0_33, %c0_34] : memref<16x32xbf16, #tpu.memory_space<vmem>>, vector<16x32xbf16>
    %c0_35 = arith.constant 0 : index
    %c0_36 = arith.constant 0 : index
    %c0_37 = arith.constant 0 : index
    %116 = vector.load %arg9[%c0_35, %c0_36, %c0_37] : memref<1x32x32xbf16, #tpu.memory_space<vmem>>, vector<1x32x32xbf16>
    %117 = vector.shape_cast %116 : vector<1x32x32xbf16> to vector<32x32xbf16>
    %cst_38 = arith.constant dense<0.000000e+00> : vector<16x32xf32>
    %118 = tpu.matmul %115, %117, %cst_38 {dimension_numbers = #tpu.dot_dimension_numbers<[1], [0], [0], [1], [0, 0, 1, 1], [], []>} : vector<16x32xbf16>, vector<32x32xbf16>, vector<16x32xf32> -> vector<16x32xf32>
    %c0_39 = arith.constant 0 : index
    %c0_40 = arith.constant 0 : index
    %c0_41 = arith.constant 0 : index
    %119 = vector.load %arg10[%c0_39, %c0_40, %c0_41] : memref<1x1x32xf32, #tpu.memory_space<vmem>>, vector<1x1x32xf32>
    %120 = vector.shape_cast %119 : vector<1x1x32xf32> to vector<1x32xf32>
    %121 = vector.broadcast %120 : vector<1x32xf32> to vector<16x32xf32>
    %122 = arith.addf %118, %121 : vector<16x32xf32>
    %123 = arith.addf %3, %122 : vector<16x32xf32>
    %c0_42 = arith.constant 0 : index
    %c0_43 = arith.constant 0 : index
    %c0_44 = arith.constant 0 : index
    %124 = vector.load %arg11[%c0_42, %c0_43, %c0_44] : memref<1x1x32xf32, #tpu.memory_space<vmem>>, vector<1x1x32xf32>
    %125 = vector.shape_cast %124 : vector<1x1x32xf32> to vector<1x32xf32>
    %c0_45 = arith.constant 0 : index
    %c0_46 = arith.constant 0 : index
    %c0_47 = arith.constant 0 : index
    %126 = vector.load %arg12[%c0_45, %c0_46, %c0_47] : memref<1x1x32xf32, #tpu.memory_space<vmem>>, vector<1x1x32xf32>
    %127 = vector.shape_cast %126 : vector<1x1x32xf32> to vector<1x32xf32>
    %cst_48 = arith.constant dense<0.000000e+00> : vector<16xf32>
    %128 = vector.multi_reduction <add>, %123, %cst_48 [1] : vector<16x32xf32> to vector<16xf32>
    %129 = vector.shape_cast %128 : vector<16xf32> to vector<16x1xf32>
    %cst_49 = arith.constant 3.200000e+01 : f32
    %130 = vector.broadcast %cst_49 : f32 to vector<16x1xf32>
    %131 = arith.divf %129, %130 : vector<16x1xf32>
    %132 = vector.broadcast %131 : vector<16x1xf32> to vector<16x32xf32>
    %133 = arith.subf %123, %132 : vector<16x32xf32>
    %134 = arith.mulf %133, %133 : vector<16x32xf32>
    %cst_50 = arith.constant dense<0.000000e+00> : vector<16xf32>
    %135 = vector.multi_reduction <add>, %134, %cst_50 [1] : vector<16x32xf32> to vector<16xf32>
    %136 = vector.shape_cast %135 : vector<16xf32> to vector<16x1xf32>
    %cst_51 = arith.constant 3.200000e+01 : f32
    %137 = vector.broadcast %cst_51 : f32 to vector<16x1xf32>
    %138 = arith.divf %136, %137 : vector<16x1xf32>
    %cst_52 = arith.constant 9.99999996E-13 : f32
    %139 = vector.broadcast %cst_52 : f32 to vector<16x1xf32>
    %140 = arith.addf %138, %139 : vector<16x1xf32>
    %141 = math.rsqrt %140 : vector<16x1xf32>
    %142 = vector.broadcast %141 : vector<16x1xf32> to vector<16x32xf32>
    %143 = arith.mulf %133, %142 : vector<16x32xf32>
    %144 = vector.broadcast %125 : vector<1x32xf32> to vector<16x32xf32>
    %145 = arith.mulf %143, %144 : vector<16x32xf32>
    %146 = vector.broadcast %127 : vector<1x32xf32> to vector<16x32xf32>
    %147 = arith.addf %145, %146 : vector<16x32xf32>
    %148 = arith.truncf %147 : vector<16x32xf32> to vector<16x32xbf16>
    %c0_53 = arith.constant 0 : index
    %c0_54 = arith.constant 0 : index
    %c0_55 = arith.constant 0 : index
    %149 = vector.load %arg13[%c0_53, %c0_54, %c0_55] : memref<1x32x64xbf16, #tpu.memory_space<vmem>>, vector<1x32x64xbf16>
    %150 = vector.shape_cast %149 : vector<1x32x64xbf16> to vector<32x64xbf16>
    %cst_56 = arith.constant dense<0.000000e+00> : vector<16x64xf32>
    %151 = tpu.matmul %148, %150, %cst_56 {dimension_numbers = #tpu.dot_dimension_numbers<[1], [0], [0], [1], [0, 0, 1, 1], [], []>} : vector<16x32xbf16>, vector<32x64xbf16>, vector<16x64xf32> -> vector<16x64xf32>
    %c0_57 = arith.constant 0 : index
    %c0_58 = arith.constant 0 : index
    %c0_59 = arith.constant 0 : index
    %152 = vector.load %arg14[%c0_57, %c0_58, %c0_59] : memref<1x1x64xf32, #tpu.memory_space<vmem>>, vector<1x1x64xf32>
    %153 = vector.shape_cast %152 : vector<1x1x64xf32> to vector<1x64xf32>
    %154 = vector.broadcast %153 : vector<1x64xf32> to vector<16x64xf32>
    %155 = arith.addf %151, %154 : vector<16x64xf32>
    %cst_60 = arith.constant 5.000000e-01 : f32
    %156 = vector.broadcast %cst_60 : f32 to vector<16x64xf32>
    %157 = arith.mulf %156, %155 : vector<16x64xf32>
    %cst_61 = arith.constant 4.471500e-02 : f32
    %158 = vector.broadcast %cst_61 : f32 to vector<16x64xf32>
    %159 = arith.mulf %158, %155 : vector<16x64xf32>
    %160 = arith.mulf %159, %155 : vector<16x64xf32>
    %161 = arith.mulf %160, %155 : vector<16x64xf32>
    %162 = arith.addf %155, %161 : vector<16x64xf32>
    %cst_62 = arith.constant 0.797884583 : f32
    %163 = vector.broadcast %cst_62 : f32 to vector<16x64xf32>
    %164 = arith.mulf %163, %162 : vector<16x64xf32>
    %165 = math.tanh %164 : vector<16x64xf32>
    %cst_63 = arith.constant 1.000000e+00 : f32
    %166 = vector.broadcast %cst_63 : f32 to vector<16x64xf32>
    %167 = arith.addf %166, %165 : vector<16x64xf32>
    %168 = arith.mulf %157, %167 : vector<16x64xf32>
    %169 = arith.truncf %168 : vector<16x64xf32> to vector<16x64xbf16>
    %c0_64 = arith.constant 0 : index
    %c0_65 = arith.constant 0 : index
    %c0_66 = arith.constant 0 : index
    %170 = vector.load %arg15[%c0_64, %c0_65, %c0_66] : memref<1x64x32xbf16, #tpu.memory_space<vmem>>, vector<1x64x32xbf16>
    %171 = vector.shape_cast %170 : vector<1x64x32xbf16> to vector<64x32xbf16>
    %cst_67 = arith.constant dense<0.000000e+00> : vector<16x32xf32>
    %172 = tpu.matmul %169, %171, %cst_67 {dimension_numbers = #tpu.dot_dimension_numbers<[1], [0], [0], [1], [0, 0, 1, 1], [], []>} : vector<16x64xbf16>, vector<64x32xbf16>, vector<16x32xf32> -> vector<16x32xf32>
    %c0_68 = arith.constant 0 : index
    %c0_69 = arith.constant 0 : index
    %c0_70 = arith.constant 0 : index
    %173 = vector.load %arg16[%c0_68, %c0_69, %c0_70] : memref<1x1x32xf32, #tpu.memory_space<vmem>>, vector<1x1x32xf32>
    %174 = vector.shape_cast %173 : vector<1x1x32xf32> to vector<1x32xf32>
    %175 = vector.broadcast %174 : vector<1x32xf32> to vector<16x32xf32>
    %176 = arith.addf %172, %175 : vector<16x32xf32>
    %177 = arith.addf %147, %176 : vector<16x32xf32>
    %c0_71 = arith.constant 0 : index
    %c0_72 = arith.constant 0 : index
    %c0_73 = arith.constant 0 : index
    %178 = vector.load %arg17[%c0_71, %c0_72, %c0_73] : memref<1x1x32xf32, #tpu.memory_space<vmem>>, vector<1x1x32xf32>
    %179 = vector.shape_cast %178 : vector<1x1x32xf32> to vector<1x32xf32>
    %c0_74 = arith.constant 0 : index
    %c0_75 = arith.constant 0 : index
    %c0_76 = arith.constant 0 : index
    %180 = vector.load %arg18[%c0_74, %c0_75, %c0_76] : memref<1x1x32xf32, #tpu.memory_space<vmem>>, vector<1x1x32xf32>
    %181 = vector.shape_cast %180 : vector<1x1x32xf32> to vector<1x32xf32>
    %cst_77 = arith.constant dense<0.000000e+00> : vector<16xf32>
    %182 = vector.multi_reduction <add>, %177, %cst_77 [1] : vector<16x32xf32> to vector<16xf32>
    %183 = vector.shape_cast %182 : vector<16xf32> to vector<16x1xf32>
    %cst_78 = arith.constant 3.200000e+01 : f32
    %184 = vector.broadcast %cst_78 : f32 to vector<16x1xf32>
    %185 = arith.divf %183, %184 : vector<16x1xf32>
    %186 = vector.broadcast %185 : vector<16x1xf32> to vector<16x32xf32>
    %187 = arith.subf %177, %186 : vector<16x32xf32>
    %188 = arith.mulf %187, %187 : vector<16x32xf32>
    %cst_79 = arith.constant dense<0.000000e+00> : vector<16xf32>
    %189 = vector.multi_reduction <add>, %188, %cst_79 [1] : vector<16x32xf32> to vector<16xf32>
    %190 = vector.shape_cast %189 : vector<16xf32> to vector<16x1xf32>
    %cst_80 = arith.constant 3.200000e+01 : f32
    %191 = vector.broadcast %cst_80 : f32 to vector<16x1xf32>
    %192 = arith.divf %190, %191 : vector<16x1xf32>
    %cst_81 = arith.constant 9.99999996E-13 : f32
    %193 = vector.broadcast %cst_81 : f32 to vector<16x1xf32>
    %194 = arith.addf %192, %193 : vector<16x1xf32>
    %195 = math.rsqrt %194 : vector<16x1xf32>
    %196 = vector.broadcast %195 : vector<16x1xf32> to vector<16x32xf32>
    %197 = arith.mulf %187, %196 : vector<16x32xf32>
    %198 = vector.broadcast %179 : vector<1x32xf32> to vector<16x32xf32>
    %199 = arith.mulf %197, %198 : vector<16x32xf32>
    %200 = vector.broadcast %181 : vector<1x32xf32> to vector<16x32xf32>
    %201 = arith.addf %199, %200 : vector<16x32xf32>
    %c0_82 = arith.constant 0 : index
    %c0_83 = arith.constant 0 : index
    %202 = vector.load %arg20[%c0_82, %c0_83] : memref<16x32xf32, #tpu.memory_space<vmem>>, vector<16x32xf32>
    tpu.vector_store %arg20[%c0_82, %c0_83], %201 {strides = array<i32>} : memref<16x32xf32, #tpu.memory_space<vmem>>, vector<16x32xf32>,
    %203 = arith.truncf %201 : vector<16x32xf32> to vector<16x32xbf16>
    %c0_84 = arith.constant 0 : index
    %c0_85 = arith.constant 0 : index
    %c0_86 = arith.constant 0 : index
    %204 = vector.load %arg19[%c0_84, %c0_85, %c0_86] : memref<1x16x32xbf16, #tpu.memory_space<vmem>>, vector<1x16x32xbf16>
    %205 = vector.shape_cast %204 : vector<1x16x32xbf16> to vector<16x32xbf16>
    %206 = vector.shape_cast %203 : vector<16x32xbf16> to vector<1x16x32xbf16>
    tpu.vector_store %arg19[%c0_84, %c0_85, %c0_86], %206 {strides = array<i32>} : memref<1x16x32xbf16, #tpu.memory_space<vmem>>, vector<1x16x32xbf16>,
    return
  }
  func.func @transform_0(%arg0: i32) -> (i32, i32) {
    %c0_i32 = arith.constant 0 : i32
    %c0_i32_0 = arith.constant 0 : i32
    %c0_i32_1 = arith.constant 0 : i32
    return %c0_i32, %c0_i32_0 : i32, i32
  }
  func.func @transform_1(%arg0: i32) -> (i32, i32) {
    %c0_i32 = arith.constant 0 : i32
    %c0_i32_0 = arith.constant 0 : i32
    %c0_i32_1 = arith.constant 0 : i32
    return %c0_i32, %c0_i32_0 : i32, i32
  }
  func.func @transform_2(%arg0: i32) -> (i32, i32) {
    %c0_i32 = arith.constant 0 : i32
    %c0_i32_0 = arith.constant 0 : i32
    %c0_i32_1 = arith.constant 0 : i32
    return %c0_i32, %c0_i32_0 : i32, i32
  }
  func.func @transform_3(%arg0: i32) -> (i32, i32) {
    %c0_i32 = arith.constant 0 : i32
    %c0_i32_0 = arith.constant 0 : i32
    %c0_i32_1 = arith.constant 0 : i32
    return %c0_i32, %c0_i32_0 : i32, i32
  }
  func.func @transform_4(%arg0: i32) -> (i32, i32) {
    %c0_i32 = arith.constant 0 : i32
    %c0_i32_0 = arith.constant 0 : i32
    %c0_i32_1 = arith.constant 0 : i32
    return %c0_i32, %c0_i32_0 : i32, i32
  }
  func.func @transform_5(%arg0: i32) -> (i32, i32) {
    %c0_i32 = arith.constant 0 : i32
    %c0_i32_0 = arith.constant 0 : i32
    %c0_i32_1 = arith.constant 0 : i32
    return %c0_i32, %c0_i32_0 : i32, i32
  }
  func.func @transform_6(%arg0: i32) -> (i32, i32, i32) {
    %c0_i32 = arith.constant 0 : i32
    %c0_i32_0 = arith.constant 0 : i32
    %c0_i32_1 = arith.constant 0 : i32
    return %arg0, %c0_i32, %c0_i32_0 : i32, i32, i32
  }
  func.func @transform_7(%arg0: i32) -> (i32, i32, i32) {
    %c0_i32 = arith.constant 0 : i32
    %c0_i32_0 = arith.constant 0 : i32
    %c0_i32_1 = arith.constant 0 : i32
    return %arg0, %c0_i32, %c0_i32_0 : i32, i32, i32
  }
  func.func @transform_8(%arg0: i32) -> (i32, i32, i32) {
    %c0_i32 = arith.constant 0 : i32
    %c0_i32_0 = arith.constant 0 : i32
    %c0_i32_1 = arith.constant 0 : i32
    return %arg0, %c0_i32, %c0_i32_0 : i32, i32, i32
  }
  func.func @transform_9(%arg0: i32) -> (i32, i32, i32) {
    %c0_i32 = arith.constant 0 : i32
    %c0_i32_0 = arith.constant 0 : i32
    %c0_i32_1 = arith.constant 0 : i32
    return %arg0, %c0_i32, %c0_i32_0 : i32, i32, i32
  }
  func.func @transform_10(%arg0: i32) -> (i32, i32, i32) {
    %c0_i32 = arith.constant 0 : i32
    %c0_i32_0 = arith.constant 0 : i32
    %c0_i32_1 = arith.constant 0 : i32
    return %arg0, %c0_i32, %c0_i32_0 : i32, i32, i32
  }
  func.func @transform_11(%arg0: i32) -> (i32, i32, i32) {
    %c0_i32 = arith.constant 0 : i32
    %c0_i32_0 = arith.constant 0 : i32
    %c0_i32_1 = arith.constant 0 : i32
    return %arg0, %c0_i32, %c0_i32_0 : i32, i32, i32
  }
  func.func @transform_12(%arg0: i32) -> (i32, i32, i32) {
    %c0_i32 = arith.constant 0 : i32
    %c0_i32_0 = arith.constant 0 : i32
    %c0_i32_1 = arith.constant 0 : i32
    return %arg0, %c0_i32, %c0_i32_0 : i32, i32, i32
  }
  func.func @transform_13(%arg0: i32) -> (i32, i32, i32) {
    %c0_i32 = arith.constant 0 : i32
    %c0_i32_0 = arith.constant 0 : i32
    %c0_i32_1 = arith.constant 0 : i32
    return %arg0, %c0_i32, %c0_i32_0 : i32, i32, i32
  }
  func.func @transform_14(%arg0: i32) -> (i32, i32, i32) {
    %c0_i32 = arith.constant 0 : i32
    %c0_i32_0 = arith.constant 0 : i32
    %c0_i32_1 = arith.constant 0 : i32
    return %arg0, %c0_i32, %c0_i32_0 : i32, i32, i32
  }
  func.func @transform_15(%arg0: i32) -> (i32, i32, i32) {
    %c0_i32 = arith.constant 0 : i32
    %c0_i32_0 = arith.constant 0 : i32
    %c0_i32_1 = arith.constant 0 : i32
    return %arg0, %c0_i32, %c0_i32_0 : i32, i32, i32
  }
  func.func @transform_16(%arg0: i32) -> (i32, i32, i32) {
    %c0_i32 = arith.constant 0 : i32
    %c0_i32_0 = arith.constant 0 : i32
    %c0_i32_1 = arith.constant 0 : i32
    return %arg0, %c0_i32, %c0_i32_0 : i32, i32, i32
  }
  func.func @transform_17(%arg0: i32) -> (i32, i32, i32) {
    %c0_i32 = arith.constant 0 : i32
    %c0_i32_0 = arith.constant 0 : i32
    %c0_i32_1 = arith.constant 0 : i32
    return %arg0, %c0_i32, %c0_i32_0 : i32, i32, i32
  }
  func.func @transform_18(%arg0: i32) -> (i32, i32, i32) {
    %c0_i32 = arith.constant 0 : i32
    %c0_i32_0 = arith.constant 0 : i32
    %c0_i32_1 = arith.constant 0 : i32
    return %arg0, %c0_i32, %c0_i32_0 : i32, i32, i32
  }
}

</mosaic_0001>

<bundles_post_ra>
// kernel: tpu_custom_call.1
= control target key start
LH: loop header
LB: loop body
LE: loop exit
PB: predicated region body
PF: predicated region fallthrough
CT: control target
= control target key end

     0   :  { %s5018_s0 = inlined_call_operand.hbm [shape: f32[16,16], index: 0, kind: input, shape index: {}]   ;;  %s5019_s1 = inlined_call_operand.hbm [shape: f32[1,16], index: 1, kind: input, shape index: {}]   ;;  %s5020_s2 = inlined_call_operand.hbm [shape: f32[1,16], index: 2, kind: input, shape index: {}]   ;;  %s5021_s3 = inlined_call_operand.hbm [shape: bf16[16,32], index: 3, kind: input, shape index: {}]   ;;  %s5022_s4 = inlined_call_operand.hbm [shape: f32[1,32], index: 4, kind: input, shape index: {}]   ;;  %s5023_s5 = inlined_call_operand.hbm [shape: f32[2,8], index: 5, kind: input, shape index: {}]   ;;  %s5024_s6 = inlined_call_operand.hbm [shape: bf16[4,32,96], index: 6, kind: input, shape index: {}]   ;;  %s5025_s7 = inlined_call_operand.hbm [shape: f32[4,1,96], index: 7, kind: input, shape index: {}]   ;;  %s5026_s8 = inlined_call_operand.hbm [shape: bf16[4,32,32], index: 8, kind: input, shape index: {}]   ;;  %s5027_s9 = inlined_call_operand.hbm [shape: f32[4,1,32], index: 9, kind: input, shape index: {}]   ;;  %s5028_s10 = inlined_call_operand.hbm [shape: f32[4,1,32], index: 10, kind: input, shape index: {}]   ;;  %s5029_s11 = inlined_call_operand.hbm [shape: f32[4,1,32], index: 11, kind: input, shape index: {}]   ;;  %s5030_s12 = inlined_call_operand.hbm [shape: bf16[4,32,64], index: 12, kind: input, shape index: {}]   ;;  %s5031_s13 = inlined_call_operand.hbm [shape: f32[4,1,64], index: 13, kind: input, shape index: {}]   ;;  %s5032_s14 = inlined_call_operand.hbm [shape: bf16[4,64,32], index: 14, kind: input, shape index: {}]   ;;  %s5033_s15 = inlined_call_operand.hbm [shape: f32[4,1,32], index: 15, kind: input, shape index: {}]   ;;  %s5034_s16 = inlined_call_operand.hbm [shape: f32[4,1,32], index: 16, kind: input, shape index: {}]   ;;  %s5035_s17 = inlined_call_operand.hbm [shape: f32[4,1,32], index: 17, kind: input, shape index: {}]   ;;  %s5036_s18 = inlined_call_operand.hbm [shape: bf16[4,16,32], index: 18, kind: output, shape index: {}]  }
   0x1   :  { %5085 = sst [smem:[#allocation46_spill]] %s5018_s0 }
   0x2   :  { %5086 = sst [smem:[#allocation47_spill]] %s5019_s1 }
   0x3   :  { %5087 = sst [smem:[#allocation48_spill]] %s5020_s2 }
   0x4   :  { %5088 = sst [smem:[#allocation49_spill]] %s5021_s3 }
   0x5   :  { %5089 = sst [smem:[#allocation50_spill]] %s5022_s4 }
   0x6   :  { %5090 = sst [smem:[#allocation51_spill]] %s5023_s5 }
   0x7   :  { %5091 = sst [smem:[#allocation52_spill]] %s5024_s6 }
   0x8   :  { %5092 = sst [smem:[#allocation53_spill]] %s5025_s7 }
   0x9   :  { %5093 = sst [smem:[#allocation54_spill]] %s5026_s8 }
   0xa   :  { %5094 = sst [smem:[#allocation55_spill]] %s5027_s9 }
   0xb   :  { %5095 = sst [smem:[#allocation56_spill]] %s5034_s16 }
   0xc   :  { %5096 = sst [smem:[#allocation57_spill]] %s5035_s17 }
   0xd   :  { %5097 = sst [smem:[#allocation58_spill]] %s5036_s18 }
   0xe   :  { %23 = vsyncpa [#allocation5], 0 }
   0xf   :  { %24 = vsyncpa [#allocation8], 0 }
  0x10   :  { %25 = vsyncpa [#allocation11], 0 }
  0x11   :  { %26 = vsyncpa [#allocation14], 0 }
  0x12   :  { %27 = vsyncpa [#allocation6], 0 }
  0x13   :  { %29 = vsyncpa [#allocation6 + $0x1], 0  ;;  %s4129_s27 = smov 0   ;;  %s4131_s28 = smov 0  }
  0x14   :  { %s4133_s29 = smov 0   ;;  %s4135_s30 = smov 0  }
  0x15 LB: > { %5098 = sst [smem:[#allocation34_spill]] %s3977_s27  ;;  %s4150_s0 = sadd.s32 4294967295, %s3989_s30   ;;  %s3989_s30 = sphi %s4135_s30, %s5172_s30   ;;  %s3985_s29 = sphi %s4133_s29, %s5175_s29   ;;  %s3981_s28 = sphi %s4131_s28, %s5174_s28   ;;  %s3977_s27 = sphi %s4129_s27, %s5173_s27  }
  0x16   : > { %5099 = sst [smem:[#allocation35_spill]] %s3981_s28  ;;  %s2845_s19 = sadd.s32 4294967294, %s3989_s30  }
  0x17   : > { %5100 = sst [smem:[#allocation36_spill]] %s3985_s29  ;;  %s4154_s1 = sadd.s32 1, %s3989_s30  }
  0x18   : > { %5101 = sst [smem:[#allocation37_spill]] %s4150_s0  ;;  %s168_s20 = sadd.s32 1, %s3985_s29 }
  0x19   : > { %5102 = sst [smem:[#allocation38_spill]] %s4154_s1  ;;  %s165_s21 = ssub.s32 %s3989_s30, %s4154_s1 }
  0x1a   : > { %p175_p0 = scmp.ne.s32.totalorder %s3985_s29, %s3981_s28  ;;  %p166_p1 = scmp.eq.s32.totalorder %s165_s21, 0 }
  0x1b   : > { %p176_p2 = scmp.eq.s32.totalorder %s3989_s30, 0  ;;  %p181_p3 = scmp.ne.s32.totalorder %s3981_s28, %s3977_s27 }
  0x1c   : > { %p5050_p4 = scmp.eq.s32.totalorder %s4150_s0, 0  ;;  %p491_p7 = scmp.eq.s32.totalorder %s4150_s0, 3 }
  0x1d   : > { %s4166_s22 = scalar_select %p166_p1, %s3985_s29, %s168_s20  }
  0x1e   : > { %p4168_p5 = por %p176_p2, %p175_p0  ;;  %p4174_p6 = por %p5050_p4, %p181_p3 }
  0x1f   : > { %5103 = sst [smem:[#allocation39_spill]] %s4166_s22  ;;  %p497_p8 = scmp.eq.s32.totalorder %s2845_s19, 3 }
  0x20   : > { %s5104_s2 = scalar_select %p4168_p5, 1, 0 }
  0x21   : > { %s5105_s23 = scalar_select %p4174_p6, 1, 0 }
  0x22   : > { %p2846_p9 = scmp.ge.s32.totalorder %s3989_s30, 1  ;;  %p504_p10 = scmp.lt.s32.totalorder %s3989_s30, 5 }
  0x23   : > { %5106 = sst [smem:[#allocation40_spill]] %s5105_s23  ;;  %p4181_p11 = por %p491_p7, %p175_p0 }
  0x24   : > { %p4185_p12 = por %p497_p8, %p181_p3  ;;  %p4189_p13 = pnand %p2846_p9, %p504_p10 }
  0x25   : > { %s5107_s24 = scalar_select %p4181_p11, 1, 0 }
  0x26   : > { %s5109_s25 = scalar_select %p4185_p12, 1, 0 }
  0x27   : > { %5108 = sst [smem:[#allocation41_spill]] %s5107_s24  ;;  %p3184_p2 = pneg %p4189_p13 }
  0x28   : > { %5110 = sst [smem:[#allocation42_spill]] %s5109_s25  ;;  %s3991_s20 = smov [#allocation4]  }
  0x29   : > { %s5111_s26 = scalar_select %p4189_p13, 1, 0 }
  0x2a   : > { %s516_s19 = sshll.u32 %s3991_s20, 4  ;;  %p4198_p0 = pnand %p3184_p2, %p5050_p4  ;;  %s517_s19 = int_to_ptr.vmem [resolvable:$true] %s516_s19 }
  0x2b   : > { %5112 = sst [smem:[#allocation43_spill]] %s5111_s26  ;;  %s5115_s25 = sld [smem:[#allocation46_spill]] }
  0x2c   : > { %s5113_s21 = scalar_select %p4198_p0, 1, 0 }
  0x2d   : > { %p4211_p8 = pneg %p4198_p0 }
  0x2e   : > { %5114 = sst [smem:[#allocation44_spill]] %s5113_s21 }
  0x2f   : > { %s5116_s23 = scalar_select %p4211_p8, 1, 0 }
  0x31   : > { %s3379_s27 = scalar_lea.hbm %s5115_s25, 256  ;;  %5117 = sst [smem:[#allocation45_spill]] %s5116_s23 }
  0x32   : > { %p3380_p7 = scmp.ne.s32.totalorder %s5115_s25, %s3379_s27  ;;  %p3386_p2 = scmp.lt.u32.totalorder %s3379_s27, %s5115_s25 }
  0x34   : > { %p3382_p9 = pnand %p4211_p8, %p3380_p7 }
  0x36   : > { %p3383_p10 = pneg %p3382_p9 }
  0x38   : > { %p3388_p1 = pnand %p3386_p2, %p3383_p10 }
  0x3a   : > { %3391 = shalt.err (!%p3388_p1)
}
  0x3b   : > { %s3392_s1 = scalar_lea.vmem %s517_s19, 256  ;;  %p3400_p11 = scmp.lt.s32.totalorder %s517_s19, %s517_s19 }
  0x3c   : > { %p3393_p4 = scmp.ne.s32.totalorder %s517_s19, %s3392_s1  ;;  %p3401_p6 = scmp.lt.s32.totalorder %s3392_s1, %s3392_s1 }
  0x3e   : > { %p3395_p3 = pnand %p3393_p4, %p4211_p8  ;;  %p3402_p13 = por %p3401_p6, %p3400_p11 }
  0x40   : > { %p3396_p12 = pneg %p3395_p3 }
  0x42   : > { %p3403_p5 = pnand %p3402_p13, %p3396_p12 }
  0x44   : > { %3406 = shalt.err (!%p3403_p5)
}
  0x45   : > { %s3992_s18 = smov 128   ;;  %s3993_s27 = smov 8  }
  0x46   : > { %3187 = dma.hbm_to_vmem [thread:$0]  (!%p4198_p0), %s5115_s25, 256, %s517_s19, [#allocation5], %s3992_s18, %s3992_s18, %s3993_s27  }
  0x47   : > { %p5118_p4 = scmp.ne.s32.totalorder %s5104_s2, 0  ;;  %p5119_p1 = scmp.lt.s32.totalorder %s3989_s30, 4 }
  0x48   : > { %s587_s20 = sand.u32 1, %s3989_s30   ;;  %s4237_s1 = sand.u32 1, %s3985_s29  }
  0x49   : > { %p4231_p3 = pnand %p5119_p1, %p5118_p4  ;;  %s4240_s0 = sshll.u32 %s4237_s1, 4 }
  0x4a   : > { %s4243_s26 = sshll.u32 %s3989_s30, 8  ;;  %s5121_s6 = sld [smem:[#allocation52_spill]] }
  0x4b   : > { %s5120_s24 = scalar_select %p4231_p3, 1, 0 }
  0x4c   : > { %s591_s19 = scalar_lea.vmem [#allocation15], %s4240_s0  ;;  %s4254_s27 = scalar_lea.sflag [#allocation5], %s587_s20 }
  0x4d   : > { %s598_s18 = sshll.u32 %s591_s19, 4  ;;  %p4260_p6 = pneg %p4231_p3  ;;  %s4252_s18 = int_to_ptr.vmem [resolvable:$true] %s598_s18 }
  0x4f   : > { %s5122_s25 = scalar_select %p4260_p6, 1, 0 }
  0x50   : > { %s4249_s2 = scalar_lea.hbm %s5121_s6, %s4243_s26  ;;  %s3412_s29 = scalar_lea.hbm %s5121_s6, 1024 }
  0x51   : > { %s3407_s22 = scalar_lea.hbm %s4249_s2, 256  ;;  %p3413_p13 = scmp.lt.u32.totalorder %s4249_s2, %s5121_s6 }
  0x52   : > { %p3408_p5 = scmp.ne.s32.totalorder %s4249_s2, %s3407_s22  ;;  %p3414_p7 = scmp.lt.u32.totalorder %s3412_s29, %s3407_s22 }
  0x53   : > { %p3416_p10 = scmp.lt.u32.totalorder %s3407_s22, %s4249_s2 }
  0x54   : > { %p3410_p11 = pnand %p4260_p6, %p3408_p5  ;;  %p3415_p9 = por %p3414_p7, %p3413_p13 }
  0x56   : > { %p3411_p12 = pneg %p3410_p11  ;;  %p3417_p2 = por %p3416_p10, %p3415_p9 }
  0x58   : > { %p3418_p4 = pnand %p3417_p2, %p3411_p12 }
  0x5a   : > { %3421 = shalt.err (!%p3418_p4)
}
  0x5b   : > { %s3422_s20 = scalar_lea.vmem %s4252_s18, 256  ;;  %s3994_s17 = smov [#allocation15]  }
  0x5c   : > { %p3423_p1 = scmp.ne.s32.totalorder %s4252_s18, %s3422_s20  ;;  %s3427_s28 = sshll.u32 %s3994_s17, 4  ;;  %s3428_s28 = int_to_ptr.vmem [resolvable:$false] %s3427_s28 }
  0x5d   : > { %s3429_s5 = scalar_lea.vmem %s3428_s28, 512  ;;  %p3430_p0 = scmp.lt.s32.totalorder %s4252_s18, %s3428_s28 }
  0x5e   : > { %p3425_p5 = pnand %p3423_p1, %p4260_p6  ;;  %p3431_p8 = scmp.lt.s32.totalorder %s3429_s5, %s3422_s20 }
  0x60   : > { %p3426_p11 = pneg %p3425_p5  ;;  %p3432_p13 = por %p3431_p8, %p3430_p0 }
  0x62   : > { %p3433_p7 = pnand %p3432_p13, %p3426_p11 }
  0x64   : > { %3436 = shalt.err (!%p3433_p7)
}
  0x65   : > { %s5072_s29 = smov 64   ;;  %s5079_s22 = smov 4  }
  0x66   : > { %3206 = dma.hbm_to_vmem [thread:$0]  (!%p4231_p3), %s4249_s2, 256, %s4252_s18, %s4254_s27, %s5072_s29, %s5072_s29, %s5079_s22  }
  0x67   : > { %s4288_s19 = sshll.u32 %s3989_s30, 4  ;;  %s611_s20 = scalar_lea.vmem [#allocation16], %s4237_s1 }
  0x68   : > { %s618_s17 = sshll.u32 %s611_s20, 4  ;;  %s5123_s7 = sld [smem:[#allocation53_spill]]  ;;  %s619_s17 = int_to_ptr.vmem [resolvable:$true] %s618_s17 }
  0x6e   : > { %s616_s6 = scalar_lea.hbm %s5123_s7, %s4288_s19  ;;  %s3442_s21 = scalar_lea.hbm %s5123_s7, 64 }
  0x6f   : > { %s3437_s4 = scalar_lea.hbm %s616_s6, 16  ;;  %p3443_p9 = scmp.lt.u32.totalorder %s616_s6, %s5123_s7 }
  0x70   : > { %p3438_p0 = scmp.ne.s32.totalorder %s616_s6, %s3437_s4  ;;  %p3444_p10 = scmp.lt.u32.totalorder %s3442_s21, %s3437_s4 }
  0x71   : > { %p3446_p4 = scmp.lt.u32.totalorder %s3437_s4, %s616_s6 }
  0x72   : > { %p3440_p8 = pnand %p3438_p0, %p4260_p6  ;;  %p3445_p2 = por %p3444_p10, %p3443_p9 }
  0x74   : > { %p3441_p12 = pneg %p3440_p8  ;;  %p3447_p1 = por %p3446_p4, %p3445_p2 }
  0x76   : > { %p3448_p5 = pnand %p3447_p1, %p3441_p12 }
  0x78   : > { %3451 = shalt.err (!%p3448_p5)
}
  0x79   : > { %s3452_s20 = scalar_lea.vmem %s619_s17, 16  ;;  %s3997_s28 = smov [#allocation16]  }
  0x7a   : > { %p3453_p11 = scmp.ne.s32.totalorder %s619_s17, %s3452_s20  ;;  %s3457_s5 = sshll.u32 %s3997_s28, 4  ;;  %s3458_s5 = int_to_ptr.vmem [resolvable:$false] %s3457_s5 }
  0x7b   : > { %s3459_s3 = scalar_lea.vmem %s3458_s5, 32  ;;  %p3460_p0 = scmp.lt.s32.totalorder %s619_s17, %s3458_s5 }
  0x7c   : > { %p3455_p13 = pnand %p3453_p11, %p4260_p6  ;;  %p3461_p8 = scmp.lt.s32.totalorder %s3459_s3, %s3452_s20 }
  0x7e   : > { %p3456_p7 = pneg %p3455_p13  ;;  %p3462_p3 = por %p3461_p8, %p3460_p0 }
  0x80   : > { %p3463_p9 = pnand %p3462_p3, %p3456_p7 }
  0x82   : > { %3466 = shalt.err (!%p3463_p9)
}
  0x83   : > { %p5124_p10 = scmp.ne.s32.totalorder %s5120_s24, 0  ;;  %s5125_s8 = sld [smem:[#allocation54_spill]] }
  0x84   : > { %s629_s2 = scalar_lea.vmem [#allocation17], %s4240_s0  ;;  %s5126_s9 = sld [smem:[#allocation55_spill]] }
  0x85   : > { %3209 = dma.hbm_to_vmem [thread:$0]  (!%p5124_p10), %s616_s6, 16, %s619_s17, %s4254_s27  }
  0x86   : > { %s636_s18 = sshll.u32 %s629_s2, 4  ;;  %s4315_s18 = int_to_ptr.vmem [resolvable:$true] %s636_s18 }
  0x89   : > { %s4312_s21 = scalar_lea.hbm %s5125_s8, %s4243_s26  ;;  %s3472_s4 = scalar_lea.hbm %s5125_s8, 1024 }
  0x8a   : > { %s4321_s5 = scalar_lea.hbm %s5126_s9, %s4288_s19  ;;  %s3467_s3 = scalar_lea.hbm %s4312_s21, 256 }
  0x8b   : > { %p3468_p3 = scmp.ne.s32.totalorder %s4312_s21, %s3467_s3  ;;  %p3473_p4 = scmp.lt.u32.totalorder %s4312_s21, %s5125_s8 }
  0x8c   : > { %p3474_p1 = scmp.lt.u32.totalorder %s3472_s4, %s3467_s3  ;;  %p3476_p11 = scmp.lt.u32.totalorder %s3467_s3, %s4312_s21 }
  0x8d   : > { %p3470_p12 = pnand %p3468_p3, %p4260_p6 }
  0x8e   : > { %p3475_p5 = por %p3474_p1, %p3473_p4 }
  0x8f   : > { %p3471_p2 = pneg %p3470_p12 }
  0x90   : > { %p3477_p13 = por %p3476_p11, %p3475_p5 }
  0x92   : > { %p3478_p7 = pnand %p3477_p13, %p3471_p2 }
  0x94   : > { %3481 = shalt.err (!%p3478_p7)
}
  0x95   : > { %s3482_s2 = scalar_lea.vmem %s4315_s18, 256  ;;  %s3998_s20 = smov [#allocation17]  }
  0x96   : > { %p3483_p0 = scmp.ne.s32.totalorder %s4315_s18, %s3482_s2  ;;  %s3487_s28 = sshll.u32 %s3998_s20, 4  ;;  %s3488_s28 = int_to_ptr.vmem [resolvable:$false] %s3487_s28 }
  0x97   : > { %s3489_s29 = scalar_lea.vmem %s3488_s28, 512  ;;  %p3490_p3 = scmp.lt.s32.totalorder %s4315_s18, %s3488_s28 }
  0x98   : > { %p3485_p8 = pnand %p3483_p0, %p4260_p6  ;;  %p3491_p12 = scmp.lt.s32.totalorder %s3489_s29, %s3482_s2 }
  0x9a   : > { %p3486_p9 = pneg %p3485_p8  ;;  %p3492_p4 = por %p3491_p12, %p3490_p3 }
  0x9c   : > { %p3493_p1 = pnand %p3492_p4, %p3486_p9 }
  0x9e   : > { %3496 = shalt.err (!%p3493_p1)
}
  0x9f   : > { %s5127_s3 = smov 64   ;;  %s649_s6 = scalar_lea.vmem [#allocation18], %s4237_s1 }
  0xa0   : > { %3212 = dma.hbm_to_vmem [thread:$0]  (!%p5124_p10), %s4312_s21, 256, %s4315_s18, %s4254_s27, %s5127_s3, %s5127_s3, %s5079_s22  }
  0xa1   : > { %s656_s17 = sshll.u32 %s649_s6, 4  ;;  %s4353_s2 = scalar_lea.hbm %s5028_s10, %s4288_s19  ;;  %s657_s17 = int_to_ptr.vmem [resolvable:$true] %s656_s17 }
  0xa2   : > { %s3497_s20 = scalar_lea.hbm %s4321_s5, 16  ;;  %s3502_s7 = scalar_lea.hbm %s5126_s9, 64 }
  0xa3   : > { %p3498_p2 = scmp.ne.s32.totalorder %s4321_s5, %s3497_s20  ;;  %p3503_p13 = scmp.lt.u32.totalorder %s4321_s5, %s5126_s9 }
  0xa4   : > { %p3504_p7 = scmp.lt.u32.totalorder %s3502_s7, %s3497_s20  ;;  %p3506_p8 = scmp.lt.u32.totalorder %s3497_s20, %s4321_s5 }
  0xa5   : > { %p3500_p5 = pnand %p3498_p2, %p4260_p6 }
  0xa6   : > { %p3505_p0 = por %p3504_p7, %p3503_p13 }
  0xa7   : > { %p3501_p11 = pneg %p3500_p5 }
  0xa8   : > { %p3507_p9 = por %p3506_p8, %p3505_p0 }
  0xaa   : > { %p3508_p3 = pnand %p3507_p9, %p3501_p11 }
  0xac   : > { %3511 = shalt.err (!%p3508_p3)
}
  0xad   : > { %s3512_s21 = scalar_lea.vmem %s657_s17, 16  ;;  %s3999_s18 = smov [#allocation18]  }
  0xae   : > { %p3513_p12 = scmp.ne.s32.totalorder %s657_s17, %s3512_s21  ;;  %s3517_s6 = sshll.u32 %s3999_s18, 4  ;;  %s3518_s6 = int_to_ptr.vmem [resolvable:$false] %s3517_s6 }
  0xaf   : > { %s3519_s4 = scalar_lea.vmem %s3518_s6, 32  ;;  %p3520_p2 = scmp.lt.s32.totalorder %s657_s17, %s3518_s6 }
  0xb0   : > { %p3515_p4 = pnand %p3513_p12, %p4260_p6  ;;  %p3521_p5 = scmp.lt.s32.totalorder %s3519_s4, %s3512_s21 }
  0xb2   : > { %p3516_p1 = pneg %p3515_p4  ;;  %p3522_p10 = por %p3521_p5, %p3520_p2 }
  0xb4   : > { %p3523_p7 = pnand %p3522_p10, %p3516_p1 }
  0xb6   : > { %3526 = shalt.err (!%p3523_p7)
}
  0xb7   : > { %p5128_p13 = scmp.ne.s32.totalorder %s5120_s24, 0  ;;  %s666_s7 = scalar_lea.vmem [#allocation19], %s4237_s1 }
  0xb8   : > { %s673_s8 = sshll.u32 %s666_s7, 4  ;;  %s4378_s20 = scalar_lea.hbm %s5029_s11, %s4288_s19  ;;  %s674_s8 = int_to_ptr.vmem [resolvable:$true] %s673_s8 }
  0xb9   : > { %3215 = dma.hbm_to_vmem [thread:$0]  (!%p5128_p13), %s4321_s5, 16, %s657_s17, %s4254_s27  }
  0xba   : > { %s3527_s28 = scalar_lea.hbm %s4353_s2, 16  ;;  %s3532_s18 = scalar_lea.hbm %s5028_s10, 64 }
  0xbb   : > { %p3528_p10 = scmp.ne.s32.totalorder %s4353_s2, %s3527_s28  ;;  %p3533_p8 = scmp.lt.u32.totalorder %s4353_s2, %s5028_s10 }
  0xbc   : > { %p3534_p9 = scmp.lt.u32.totalorder %s3532_s18, %s3527_s28  ;;  %p3536_p12 = scmp.lt.u32.totalorder %s3527_s28, %s4353_s2 }
  0xbd   : > { %p3530_p11 = pnand %p3528_p10, %p4260_p6 }
  0xbe   : > { %p3535_p3 = por %p3534_p9, %p3533_p8 }
  0xbf   : > { %p3531_p0 = pneg %p3530_p11 }
  0xc0   : > { %p3537_p4 = por %p3536_p12, %p3535_p3 }
  0xc2   : > { %p3538_p1 = pnand %p3537_p4, %p3531_p0 }
  0xc4   : > { %3541 = shalt.err (!%p3538_p1)
}
  0xc5   : > { %s3542_s5 = scalar_lea.vmem %s674_s8, 16  ;;  %s4000_s17 = smov [#allocation19]  }
  0xc6   : > { %p3543_p2 = scmp.ne.s32.totalorder %s674_s8, %s3542_s5  ;;  %s3547_s7 = sshll.u32 %s4000_s17, 4  ;;  %s3548_s7 = int_to_ptr.vmem [resolvable:$false] %s3547_s7 }
  0xc7   : > { %s3549_s23 = scalar_lea.vmem %s3548_s7, 32  ;;  %p3550_p10 = scmp.lt.s32.totalorder %s674_s8, %s3548_s7 }
  0xc8   : > { %p3545_p5 = pnand %p3543_p2, %p4260_p6  ;;  %p3551_p11 = scmp.lt.s32.totalorder %s3549_s23, %s3542_s5 }
  0xca   : > { %p3546_p7 = pneg %p3545_p5  ;;  %p3552_p13 = por %p3551_p11, %p3550_p10 }
  0xcc   : > { %p3553_p8 = pnand %p3552_p13, %p3546_p7 }
  0xce   : > { %3556 = shalt.err (!%p3553_p8)
}
  0xcf   : > { %p5129_p9 = scmp.ne.s32.totalorder %s5120_s24, 0  ;;  %s683_s16 = scalar_lea.vmem [#allocation20], %s4237_s1 }
  0xd0   : > { %s690_s28 = sshll.u32 %s683_s16, 4  ;;  %s4403_s18 = scalar_lea.hbm %s5030_s12, %s4243_s26  ;;  %s691_s28 = int_to_ptr.vmem [resolvable:$true] %s690_s28 }
  0xd1   : > { %3218 = dma.hbm_to_vmem [thread:$0]  (!%p5129_p9), %s4353_s2, 16, %s674_s8, %s4254_s27  }
  0xd2   : > { %s3557_s6 = scalar_lea.hbm %s4378_s20, 16  ;;  %s3562_s17 = scalar_lea.hbm %s5029_s11, 64 }
  0xd3   : > { %p3558_p13 = scmp.ne.s32.totalorder %s4378_s20, %s3557_s6  ;;  %p3563_p12 = scmp.lt.u32.totalorder %s4378_s20, %s5029_s11 }
  0xd4   : > { %p3564_p4 = scmp.lt.u32.totalorder %s3562_s17, %s3557_s6  ;;  %p3566_p2 = scmp.lt.u32.totalorder %s3557_s6, %s4378_s20 }
  0xd5   : > { %p3560_p0 = pnand %p3558_p13, %p4260_p6 }
  0xd6   : > { %p3565_p1 = por %p3564_p4, %p3563_p12 }
  0xd7   : > { %p3561_p3 = pneg %p3560_p0 }
  0xd8   : > { %p3567_p5 = por %p3566_p2, %p3565_p1 }
  0xda   : > { %p3568_p7 = pnand %p3567_p5, %p3561_p3 }
  0xdc   : > { %3571 = shalt.err (!%p3568_p7)
}
  0xdd   : > { %s3572_s26 = scalar_lea.vmem %s691_s28, 16  ;;  %s4001_s2 = smov [#allocation20]  }
  0xde   : > { %p3573_p10 = scmp.ne.s32.totalorder %s691_s28, %s3572_s26  ;;  %s3577_s8 = sshll.u32 %s4001_s2, 4  ;;  %s3578_s8 = int_to_ptr.vmem [resolvable:$false] %s3577_s8 }
  0xdf   : > { %s3579_s16 = scalar_lea.vmem %s3578_s8, 32  ;;  %p3580_p13 = scmp.lt.s32.totalorder %s691_s28, %s3578_s8 }
  0xe0   : > { %p3575_p11 = pnand %p3573_p10, %p4260_p6  ;;  %p3581_p0 = scmp.lt.s32.totalorder %s3579_s16, %s3572_s26 }
  0xe2   : > { %p3576_p8 = pneg %p3575_p11  ;;  %p3582_p9 = por %p3581_p0, %p3580_p13 }
  0xe4   : > { %p3583_p4 = pnand %p3582_p9, %p3576_p8 }
  0xe6   : > { %3586 = shalt.err (!%p3583_p4)
}
  0xe7   : > { %p5130_p12 = scmp.ne.s32.totalorder %s5120_s24, 0  ;;  %s701_s29 = scalar_lea.vmem [#allocation21], %s4240_s0 }
  0xe8   : > { %s708_s21 = sshll.u32 %s701_s29, 4  ;;  %s4430_s5 = scalar_lea.hbm %s5031_s13, %s4288_s19  ;;  %s4424_s21 = int_to_ptr.vmem [resolvable:$true] %s708_s21 }
  0xe9   : > { %3221 = dma.hbm_to_vmem [thread:$0]  (!%p5130_p12), %s4378_s20, 16, %s691_s28, %s4254_s27  }
  0xea   : > { %s3587_s17 = scalar_lea.hbm %s4403_s18, 256  ;;  %s3592_s26 = scalar_lea.hbm %s5030_s12, 1024 }
  0xeb   : > { %p3588_p9 = scmp.ne.s32.totalorder %s4403_s18, %s3587_s17  ;;  %p3593_p2 = scmp.lt.u32.totalorder %s4403_s18, %s5030_s12 }
  0xec   : > { %p3594_p5 = scmp.lt.u32.totalorder %s3592_s26, %s3587_s17  ;;  %p3596_p10 = scmp.lt.u32.totalorder %s3587_s17, %s4403_s18 }
  0xed   : > { %p3590_p3 = pnand %p3588_p9, %p4260_p6 }
  0xee   : > { %p3595_p7 = por %p3594_p5, %p3593_p2 }
  0xef   : > { %p3591_p1 = pneg %p3590_p3 }
  0xf0   : > { %p3597_p11 = por %p3596_p10, %p3595_p7 }
  0xf2   : > { %p3598_p8 = pnand %p3597_p11, %p3591_p1 }
  0xf4   : > { %3601 = shalt.err (!%p3598_p8)
}
  0xf5   : > { %s3602_s0 = scalar_lea.vmem %s4424_s21, 256  ;;  %s4002_s28 = smov [#allocation21]  }
  0xf6   : > { %p3603_p13 = scmp.ne.s32.totalorder %s4424_s21, %s3602_s0  ;;  %s3607_s8 = sshll.u32 %s4002_s28, 4  ;;  %s3608_s8 = int_to_ptr.vmem [resolvable:$false] %s3607_s8 }
  0xf7   : > { %s3609_s16 = scalar_lea.vmem %s3608_s8, 512  ;;  %p3610_p9 = scmp.lt.s32.totalorder %s4424_s21, %s3608_s8 }
  0xf8   : > { %p3605_p0 = pnand %p3603_p13, %p4260_p6  ;;  %p3611_p3 = scmp.lt.s32.totalorder %s3609_s16, %s3602_s0 }
  0xfa   : > { %p3606_p4 = pneg %p3605_p0  ;;  %p3612_p2 = por %p3611_p3, %p3610_p9 }
  0xfc   : > { %p3613_p5 = pnand %p3612_p2, %p3606_p4 }
  0xfe   : > { %3616 = shalt.err (!%p3613_p5)
}
  0xff   : > { %3224 = dma.hbm_to_vmem [thread:$0]  (!%p5130_p12), %s4403_s18, 256, %s4424_s21, %s4254_s27, %s5127_s3, %s5127_s3, %s5079_s22  }
 0x100   : > { %s721_s29 = scalar_lea.vmem [#allocation22], %s4237_s1  ;;  %s2868_s4 = sshll.u32 %s4237_s1, 5 }
 0x101   : > { %s728_s6 = sshll.u32 %s721_s29, 4  ;;  %s3617_s17 = scalar_lea.hbm %s4430_s5, 16  ;;  %s729_s6 = int_to_ptr.vmem [resolvable:$true] %s728_s6 }
 0x102   : > { %p3618_p1 = scmp.ne.s32.totalorder %s4430_s5, %s3617_s17  ;;  %s3622_s26 = scalar_lea.hbm %s5031_s13, 64 }
 0x103   : > { %p3623_p11 = scmp.lt.u32.totalorder %s4430_s5, %s5031_s13  ;;  %p3624_p8 = scmp.lt.u32.totalorder %s3622_s26, %s3617_s17 }
 0x104   : > { %p3620_p7 = pnand %p3618_p1, %p4260_p6  ;;  %p3626_p0 = scmp.lt.u32.totalorder %s3617_s17, %s4430_s5 }
 0x105   : > { %p3625_p13 = por %p3624_p8, %p3623_p11 }
 0x106   : > { %p3621_p10 = pneg %p3620_p7 }
 0x107   : > { %p3627_p4 = por %p3626_p0, %p3625_p13 }
 0x109   : > { %p3628_p9 = pnand %p3627_p4, %p3621_p10 }
 0x10b   : > { %3631 = shalt.err (!%p3628_p9)
}
 0x10c   : > { %s3632_s18 = scalar_lea.vmem %s729_s6, 16  ;;  %s4003_s21 = smov [#allocation22]  }
 0x10d   : > { %p3633_p3 = scmp.ne.s32.totalorder %s729_s6, %s3632_s18  ;;  %s3637_s0 = sshll.u32 %s4003_s21, 4  ;;  %s3638_s0 = int_to_ptr.vmem [resolvable:$false] %s3637_s0 }
 0x10e   : > { %s3639_s28 = scalar_lea.vmem %s3638_s0, 32  ;;  %p3640_p1 = scmp.lt.s32.totalorder %s729_s6, %s3638_s0 }
 0x10f   : > { %p3635_p2 = pnand %p3633_p3, %p4260_p6  ;;  %p3641_p7 = scmp.lt.s32.totalorder %s3639_s28, %s3632_s18 }
 0x111   : > { %p3636_p5 = pneg %p3635_p2  ;;  %p3642_p12 = por %p3641_p7, %p3640_p1 }
 0x113   : > { %p3643_p8 = pnand %p3642_p12, %p3636_p5 }
 0x115   : > { %3646 = shalt.err (!%p3643_p8)
}
 0x116   : > { %p5131_p11 = scmp.ne.s32.totalorder %s5120_s24, 0  ;;  %s2942_s8 = sshll.u32 %s3989_s30, 9 }
 0x117   : > { %s739_s16 = scalar_lea.vmem [#allocation23], %s2868_s4  ;;  %s4483_s23 = scalar_lea.hbm %s5032_s14, %s2942_s8 }
 0x118   : > { %3227 = dma.hbm_to_vmem [thread:$0]  (!%p5131_p11), %s4430_s5, 16, %s729_s6, %s4254_s27  }
 0x119   : > { %s746_s29 = sshll.u32 %s739_s16, 4  ;;  %s3647_s26 = scalar_lea.hbm %s4483_s23, 512  ;;  %s4485_s29 = int_to_ptr.vmem [resolvable:$true] %s746_s29 }
 0x11a   : > { %p3648_p12 = scmp.ne.s32.totalorder %s4483_s23, %s3647_s26  ;;  %s3652_s4 = scalar_lea.hbm %s5032_s14, 2048 }
 0x11b   : > { %p3653_p0 = scmp.lt.u32.totalorder %s4483_s23, %s5032_s14  ;;  %p3654_p4 = scmp.lt.u32.totalorder %s3652_s4, %s3647_s26 }
 0x11c   : > { %p3650_p10 = pnand %p3648_p12, %p4260_p6  ;;  %p3656_p3 = scmp.lt.u32.totalorder %s3647_s26, %s4483_s23 }
 0x11d   : > { %p3655_p9 = por %p3654_p4, %p3653_p0 }
 0x11e   : > { %p3651_p13 = pneg %p3650_p10 }
 0x11f   : > { %p3657_p2 = por %p3656_p3, %p3655_p9 }
 0x121   : > { %p3658_p5 = pnand %p3657_p2, %p3651_p13 }
 0x123   : > { %3661 = shalt.err (!%p3658_p5)
}
 0x124   : > { %s3662_s18 = scalar_lea.vmem %s4485_s29, 512  ;;  %s4004_s21 = smov [#allocation23]  }
 0x125   : > { %p3663_p1 = scmp.ne.s32.totalorder %s4485_s29, %s3662_s18  ;;  %s3667_s0 = sshll.u32 %s4004_s21, 4  ;;  %s3668_s0 = int_to_ptr.vmem [resolvable:$false] %s3667_s0 }
 0x126   : > { %s3669_s28 = scalar_lea.vmem %s3668_s0, 1024  ;;  %p3670_p12 = scmp.lt.s32.totalorder %s4485_s29, %s3668_s0 }
 0x127   : > { %p3665_p7 = pnand %p3663_p1, %p4260_p6  ;;  %p3671_p10 = scmp.lt.s32.totalorder %s3669_s28, %s3662_s18 }
 0x129   : > { %p3666_p8 = pneg %p3665_p7  ;;  %p3672_p0 = por %p3671_p10, %p3670_p12 }
 0x12b   : > { %p3673_p4 = pnand %p3672_p0, %p3666_p8 }
 0x12d   : > { %3676 = shalt.err (!%p3673_p4)
}
 0x12e   : > { %3230 = dma.hbm_to_vmem [thread:$0]  (!%p5131_p11), %s4483_s23, 512, %s4485_s29, %s4254_s27, %s5127_s3, %s5127_s3, %s5079_s22  }
 0x12f   : > { %s4516_s17 = scalar_lea.hbm %s5033_s15, %s4288_s19  ;;  %s759_s7 = scalar_lea.vmem [#allocation24], %s4237_s1 }
 0x130   : > { %s766_s26 = sshll.u32 %s759_s7, 4  ;;  %s4005_s5 = smov [#allocation7]   ;;  %s4519_s26 = int_to_ptr.vmem [resolvable:$true] %s766_s26 }
 0x131   : > { %s530_s6 = sshll.u32 %s4005_s5, 4  ;;  %s3677_s4 = scalar_lea.hbm %s4516_s17, 16  ;;  %s531_s6 = int_to_ptr.vmem [resolvable:$true] %s530_s6 }
 0x132   : > { %p3678_p13 = scmp.ne.s32.totalorder %s4516_s17, %s3677_s4  ;;  %s3682_s2 = scalar_lea.hbm %s5033_s15, 64 }
 0x133   : > { %p3683_p2 = scmp.lt.u32.totalorder %s4516_s17, %s5033_s15  ;;  %p3684_p5 = scmp.lt.u32.totalorder %s3682_s2, %s3677_s4 }
 0x134   : > { %p3680_p9 = pnand %p3678_p13, %p4260_p6  ;;  %p3686_p7 = scmp.lt.u32.totalorder %s3677_s4, %s4516_s17 }
 0x135   : > { %p3685_p1 = por %p3684_p5, %p3683_p2 }
 0x136   : > { %p3681_p3 = pneg %p3680_p9 }
 0x137   : > { %p3687_p8 = por %p3686_p7, %p3685_p1 }
 0x139   : > { %p3688_p12 = pnand %p3687_p8, %p3681_p3 }
 0x13b   : > { %3691 = shalt.err (!%p3688_p12)
}
 0x13c   : > { %s3692_s21 = scalar_lea.vmem %s4519_s26, 16  ;;  %s4006_s0 = smov [#allocation24]  }
 0x13d   : > { %p3693_p10 = scmp.ne.s32.totalorder %s4519_s26, %s3692_s21  ;;  %s3697_s28 = sshll.u32 %s4006_s0, 4  ;;  %s3698_s28 = int_to_ptr.vmem [resolvable:$false] %s3697_s28 }
 0x13e   : > { %s3699_s8 = scalar_lea.vmem %s3698_s28, 32  ;;  %p3700_p13 = scmp.lt.s32.totalorder %s4519_s26, %s3698_s28 }
 0x13f   : > { %p3695_p0 = pnand %p3693_p10, %p4260_p6  ;;  %p3701_p9 = scmp.lt.s32.totalorder %s3699_s8, %s3692_s21 }
 0x141   : > { %p3696_p4 = pneg %p3695_p0  ;;  %p3702_p2 = por %p3701_p9, %p3700_p13 }
 0x143   : > { %p3703_p5 = pnand %p3702_p2, %p3696_p4 }
 0x145   : > { %3706 = shalt.err (!%p3703_p5)
}
 0x146   : > { %s5132_s16 = sld [smem:[#allocation45_spill]]  ;;  %s5133_s4 = sld [smem:[#allocation47_spill]] }
 0x147   : > { %3233 = dma.hbm_to_vmem [thread:$0]  (!%p5131_p11), %s4516_s17, 16, %s4519_s26, %s4254_s27  }
 0x14c   : > { %s3707_s29 = scalar_lea.hbm %s5133_s4, 16  ;;  %p5134_p1 = scmp.ne.s32.totalorder %s5132_s16, 0 }
 0x14d   : > { %p3708_p3 = scmp.ne.s32.totalorder %s5133_s4, %s3707_s29  ;;  %p3714_p12 = scmp.lt.u32.totalorder %s3707_s29, %s5133_s4 }
 0x14f   : > { %p3710_p7 = pnand %p3708_p3, %p5134_p1 }
 0x151   : > { %p3711_p8 = pneg %p3710_p7 }
 0x153   : > { %p3716_p10 = pnand %p3714_p12, %p3711_p8 }
 0x155   : > { %3719 = shalt.err (!%p3716_p10)
}
 0x156   : > { %s3720_s21 = scalar_lea.vmem %s531_s6, 16  ;;  %s3727_s17 = scalar_lea.vmem %s531_s6, 32 }
 0x157   : > { %p3721_p0 = scmp.ne.s32.totalorder %s531_s6, %s3720_s21  ;;  %p3728_p9 = scmp.lt.s32.totalorder %s531_s6, %s531_s6 }
 0x158   : > { %p3729_p2 = scmp.lt.s32.totalorder %s3727_s17, %s3720_s21 }
 0x159   : > { %p3723_p4 = pnand %p3721_p0, %p5134_p1 }
 0x15a   : > { %p3730_p5 = por %p3729_p2, %p3728_p9 }
 0x15b   : > { %p3724_p13 = pneg %p3723_p4 }
 0x15d   : > { %p3731_p11 = pnand %p3730_p5, %p3724_p13 }
 0x15f   : > { %3734 = shalt.err (!%p3731_p11)
}
 0x160   : > { %s5135_s26 = sld [smem:[#allocation44_spill]]  ;;  %s4007_s8 = smov [#allocation10]  }
 0x161   : > { %s551_s7 = sshll.u32 %s4007_s8, 4  ;;  %s5137_s23 = sld [smem:[#allocation56_spill]]  ;;  %s552_s7 = int_to_ptr.vmem [resolvable:$true] %s551_s7 }
 0x162   : > { %s5138_s21 = sld [smem:[#allocation49_spill]] }
 0x166   : > { %p5136_p3 = scmp.ne.s32.totalorder %s5135_s26, 0 }
 0x167   : > { %s4565_s2 = scalar_lea.hbm %s5137_s23, %s4288_s19 }
 0x168   : > { %3190 = dma.hbm_to_vmem [thread:$0]  (!%p5136_p3), %s5133_s4, 16, %s531_s6, [#allocation8]  }
 0x169   : > { %s3735_s17 = scalar_lea.hbm %s5138_s21, 128 }
 0x16a   : > { %p3736_p11 = scmp.ne.s32.totalorder %s5138_s21, %s3735_s17  ;;  %p3742_p12 = scmp.lt.u32.totalorder %s3735_s17, %s5138_s21 }
 0x16c   : > { %p3738_p7 = pnand %p3736_p11, %p5134_p1 }
 0x16e   : > { %p3739_p8 = pneg %p3738_p7 }
 0x170   : > { %p3744_p10 = pnand %p3742_p12, %p3739_p8 }
 0x172   : > { %3747 = shalt.err (!%p3744_p10)
}
 0x173   : > { %s3748_s28 = scalar_lea.vmem %s552_s7, 128  ;;  %p3756_p9 = scmp.lt.s32.totalorder %s552_s7, %s552_s7 }
 0x174   : > { %p3749_p0 = scmp.ne.s32.totalorder %s552_s7, %s3748_s28  ;;  %p3757_p2 = scmp.lt.s32.totalorder %s3748_s28, %s3748_s28 }
 0x176   : > { %p3751_p4 = pnand %p3749_p0, %p5134_p1  ;;  %p3758_p5 = por %p3757_p2, %p3756_p9 }
 0x178   : > { %p3752_p13 = pneg %p3751_p4 }
 0x17a   : > { %p3759_p6 = pnand %p3758_p5, %p3752_p13 }
 0x17c   : > { %3762 = shalt.err (!%p3759_p6)
}
 0x17d   : > { %s5139_s9 = smov 4   ;;  %s776_s5 = scalar_lea.vmem [#allocation25], %s4237_s1 }
 0x17e   : > { %3196 = dma.hbm_to_vmem [thread:$0]  (!%p5136_p3), %s5138_s21, 128, %s552_s7, [#allocation11], %s5127_s3, %s5127_s3, %s5139_s9  }
 0x17f   : > { %s783_s29 = sshll.u32 %s776_s5, 4  ;;  %s4008_s20 = smov [#allocation9]   ;;  %s4589_s29 = int_to_ptr.vmem [resolvable:$true] %s783_s29 }
 0x180   : > { %s541_s18 = sshll.u32 %s4008_s20, 4  ;;  %s3763_s17 = scalar_lea.hbm %s4565_s2, 16  ;;  %s542_s18 = int_to_ptr.vmem [resolvable:$true] %s541_s18 }
 0x181   : > { %p3764_p6 = scmp.ne.s32.totalorder %s4565_s2, %s3763_s17  ;;  %p5140_p11 = scmp.ne.s32.totalorder %s5122_s25, 0 }
 0x182   : > { %s3768_s28 = scalar_lea.hbm %s5137_s23, 64  ;;  %p3769_p12 = scmp.lt.u32.totalorder %s4565_s2, %s5137_s23 }
 0x183   : > { %p3766_p7 = pnand %p3764_p6, %p5140_p11  ;;  %p3770_p10 = scmp.lt.u32.totalorder %s3768_s28, %s3763_s17 }
 0x184   : > { %p3772_p4 = scmp.lt.u32.totalorder %s3763_s17, %s4565_s2 }
 0x185   : > { %p3767_p8 = pneg %p3766_p7  ;;  %p3771_p0 = por %p3770_p10, %p3769_p12 }
 0x187   : > { %p3773_p13 = por %p3772_p4, %p3771_p0 }
 0x189   : > { %p3774_p9 = pnand %p3773_p13, %p3767_p8 }
 0x18b   : > { %3777 = shalt.err (!%p3774_p9)
}
 0x18c   : > { %s3778_s3 = scalar_lea.vmem %s4589_s29, 16  ;;  %s4009_s7 = smov [#allocation25]  }
 0x18d   : > { %p3779_p2 = scmp.ne.s32.totalorder %s4589_s29, %s3778_s3  ;;  %s3783_s9 = sshll.u32 %s4009_s7, 4  ;;  %s3784_s9 = int_to_ptr.vmem [resolvable:$false] %s3783_s9 }
 0x18e   : > { %s3785_s5 = scalar_lea.vmem %s3784_s9, 32  ;;  %p3786_p7 = scmp.lt.s32.totalorder %s4589_s29, %s3784_s9 }
 0x18f   : > { %p3781_p5 = pnand %p3779_p2, %p5140_p11  ;;  %p3787_p3 = scmp.lt.s32.totalorder %s3785_s5, %s3778_s3 }
 0x191   : > { %p3782_p6 = pneg %p3781_p5  ;;  %p3788_p12 = por %p3787_p3, %p3786_p7 }
 0x193   : > { %p3789_p10 = pnand %p3788_p12, %p3782_p6 }
 0x195   : > { %3792 = shalt.err (!%p3789_p10)
}
 0x196   : > { %p5141_p8 = scmp.ne.s32.totalorder %s5120_s24, 0  ;;  %s5142_s6 = sld [smem:[#allocation48_spill]] }
 0x198   : > { %3236 = dma.hbm_to_vmem [thread:$0]  (!%p5141_p8), %s4565_s2, 16, %s4589_s29, %s4254_s27  }
 0x19c   : > { %s3793_s0 = scalar_lea.hbm %s5142_s6, 16 }
 0x19d   : > { %p3794_p0 = scmp.ne.s32.totalorder %s5142_s6, %s3793_s0  ;;  %p3800_p13 = scmp.lt.u32.totalorder %s3793_s0, %s5142_s6 }
 0x19f   : > { %p3796_p3 = pnand %p3794_p0, %p5134_p1 }
 0x1a1   : > { %p3797_p4 = pneg %p3796_p3 }
 0x1a3   : > { %p3802_p9 = pnand %p3800_p13, %p3797_p4 }
 0x1a5   : > { %3805 = shalt.err (!%p3802_p9)
}
 0x1a6   : > { %s3806_s7 = scalar_lea.vmem %s542_s18, 16  ;;  %s3813_s2 = scalar_lea.vmem %s542_s18, 32 }
 0x1a7   : > { %p3807_p2 = scmp.ne.s32.totalorder %s542_s18, %s3806_s7  ;;  %p3814_p7 = scmp.lt.s32.totalorder %s542_s18, %s542_s18 }
 0x1a8   : > { %p3815_p12 = scmp.lt.s32.totalorder %s3813_s2, %s3806_s7 }
 0x1a9   : > { %p3809_p5 = pnand %p3807_p2, %p5134_p1 }
 0x1aa   : > { %p3816_p10 = por %p3815_p12, %p3814_p7 }
 0x1ab   : > { %p3810_p6 = pneg %p3809_p5 }
 0x1ad   : > { %p3817_p8 = pnand %p3816_p10, %p3810_p6 }
 0x1af   : > { %3820 = shalt.err (!%p3817_p8)
}
 0x1b0   : > { %p5143_p0 = scmp.ne.s32.totalorder %s5135_s26, 0  ;;  %s4010_s5 = smov [#allocation12]  }
 0x1b1   : > { %s565_s20 = sshll.u32 %s4010_s5, 4  ;;  %s4011_s17 = smov [#allocation13]   ;;  %s566_s20 = int_to_ptr.vmem [resolvable:$true] %s565_s20 }
 0x1b2   : > { %3193 = dma.hbm_to_vmem [thread:$0]  (!%p5143_p0), %s5142_s6, 16, %s542_s18, [#allocation8]  }
 0x1b3   : > { %s576_s0 = sshll.u32 %s4011_s17, 4  ;;  %s5144_s8 = sld [smem:[#allocation50_spill]]  ;;  %s577_s0 = int_to_ptr.vmem [resolvable:$true] %s576_s0 }
 0x1b9   : > { %s3821_s3 = scalar_lea.hbm %s5144_s8, 16 }
 0x1ba   : > { %p3822_p8 = scmp.ne.s32.totalorder %s5144_s8, %s3821_s3  ;;  %p3828_p13 = scmp.lt.u32.totalorder %s3821_s3, %s5144_s8 }
 0x1bc   : > { %p3824_p3 = pnand %p3822_p8, %p5134_p1 }
 0x1be   : > { %p3825_p4 = pneg %p3824_p3 }
 0x1c0   : > { %p3830_p9 = pnand %p3828_p13, %p3825_p4 }
 0x1c2   : > { %3833 = shalt.err (!%p3830_p9)
}
 0x1c3   : > { %s3834_s18 = scalar_lea.vmem %s566_s20, 16  ;;  %s3841_s9 = scalar_lea.vmem %s566_s20, 32 }
 0x1c4   : > { %p3835_p2 = scmp.ne.s32.totalorder %s566_s20, %s3834_s18  ;;  %p3842_p7 = scmp.lt.s32.totalorder %s566_s20, %s566_s20 }
 0x1c5   : > { %p3843_p12 = scmp.lt.s32.totalorder %s3841_s9, %s3834_s18 }
 0x1c6   : > { %p3837_p5 = pnand %p3835_p2, %p5134_p1 }
 0x1c7   : > { %p3844_p10 = por %p3843_p12, %p3842_p7 }
 0x1c8   : > { %p3838_p6 = pneg %p3837_p5 }
 0x1ca   : > { %p3845_p11 = pnand %p3844_p10, %p3838_p6 }
 0x1cc   : > { %3848 = shalt.err (!%p3845_p11)
}
 0x1cd   : > { %3199 = dma.hbm_to_vmem [thread:$0]  (!%p5143_p0), %s5144_s8, 16, %s566_s20, [#allocation11]  }
 0x1ce   : > { %s5145_s22 = sld [smem:[#allocation51_spill]] }
 0x1d4   : > { %s3849_s3 = scalar_lea.hbm %s5145_s22, 32 }
 0x1d5   : > { %p3850_p8 = scmp.ne.s32.totalorder %s5145_s22, %s3849_s3  ;;  %p3856_p11 = scmp.lt.u32.totalorder %s3849_s3, %s5145_s22 }
 0x1d7   : > { %p3852_p3 = pnand %p3850_p8, %p5134_p1 }
 0x1d9   : > { %p3853_p4 = pneg %p3852_p3 }
 0x1db   : > { %p3858_p13 = pnand %p3856_p11, %p3853_p4 }
 0x1dd   : > { %3861 = shalt.err (!%p3858_p13)
}
 0x1de   : > { %s3862_s9 = scalar_lea.vmem %s577_s0, 32  ;;  %p3870_p6 = scmp.lt.s32.totalorder %s577_s0, %s577_s0 }
 0x1df   : > { %p3863_p9 = scmp.ne.s32.totalorder %s577_s0, %s3862_s9  ;;  %p3871_p7 = scmp.lt.s32.totalorder %s3862_s9, %s3862_s9 }
 0x1e1   : > { %p3865_p2 = pnand %p3863_p9, %p5134_p1  ;;  %p3872_p12 = por %p3871_p7, %p3870_p6 }
 0x1e3   : > { %p3866_p5 = pneg %p3865_p2 }
 0x1e5   : > { %p3873_p10 = pnand %p3872_p12, %p3866_p5 }
 0x1e7   : > { %3876 = shalt.err (!%p3873_p10)
}
 0x1e8   : > { %3202 = dma.hbm_to_vmem [thread:$0]  (!%p5143_p0), %s5145_s22, 32, %s577_s0, [#allocation14]  }
 0x1e9   : > { %s5146_s28 = sld [smem:[#allocation57_spill]]  ;;  %s793_s7 = scalar_lea.vmem [#allocation26], %s4237_s1 }
 0x1ea   : > { %s800_s2 = sshll.u32 %s793_s7, 4  ;;  %p5148_p8 = scmp.ne.s32.totalorder %s5122_s25, 0  ;;  %s801_s2 = int_to_ptr.vmem [resolvable:$true] %s800_s2 }
 0x1ef   : > { %s5147_s3 = smov %s5146_s28  ;;  %s4671_s16 = scalar_lea.hbm %s5146_s28, %s4288_s19 }
 0x1f0   : > { %s3877_s26 = scalar_lea.hbm %s4671_s16, 16  ;;  %s3882_s0 = scalar_lea.hbm %s5147_s3, 64 }
 0x1f1   : > { %p3878_p1 = scmp.ne.s32.totalorder %s4671_s16, %s3877_s26  ;;  %p3883_p0 = scmp.lt.u32.totalorder %s4671_s16, %s5147_s3 }
 0x1f2   : > { %p3884_p11 = scmp.lt.u32.totalorder %s3882_s0, %s3877_s26  ;;  %p3886_p9 = scmp.lt.u32.totalorder %s3877_s26, %s4671_s16 }
 0x1f3   : > { %p3880_p3 = pnand %p3878_p1, %p5148_p8 }
 0x1f4   : > { %p3885_p13 = por %p3884_p11, %p3883_p0 }
 0x1f5   : > { %p3881_p4 = pneg %p3880_p3 }
 0x1f6   : > { %p3887_p2 = por %p3886_p9, %p3885_p13 }
 0x1f8   : > { %p3888_p5 = pnand %p3887_p2, %p3881_p4 }
 0x1fa   : > { %3891 = shalt.err (!%p3888_p5)
}
 0x1fb   : > { %s3892_s1 = scalar_lea.vmem %s801_s2, 16  ;;  %s4012_s19 = smov [#allocation26]  }
 0x1fc   : > { %p3893_p6 = scmp.ne.s32.totalorder %s801_s2, %s3892_s1  ;;  %s3897_s5 = sshll.u32 %s4012_s19, 4  ;;  %s3898_s5 = int_to_ptr.vmem [resolvable:$false] %s3897_s5 }
 0x1fd   : > { %s3899_s17 = scalar_lea.vmem %s3898_s5, 32  ;;  %p3900_p10 = scmp.lt.s32.totalorder %s801_s2, %s3898_s5 }
 0x1fe   : > { %p3895_p7 = pnand %p3893_p6, %p5148_p8  ;;  %p3901_p1 = scmp.lt.s32.totalorder %s3899_s17, %s3892_s1 }
 0x200   : > { %p3896_p12 = pneg %p3895_p7  ;;  %p3902_p3 = por %p3901_p1, %p3900_p10 }
 0x202   : > { %p3903_p0 = pnand %p3902_p3, %p3896_p12 }
 0x204   : > { %3906 = shalt.err (!%p3903_p0)
}
 0x205   : > { %p5149_p11 = scmp.ne.s32.totalorder %s5120_s24, 0  ;;  %s5150_s4 = sld [smem:[#allocation43_spill]] }
 0x207   : > { %3239 = dma.hbm_to_vmem [thread:$0]  (!%p5149_p11), %s4671_s16, 16, %s801_s2, %s4254_s27  }
 0x20b   : > { %p5151_p4 = scmp.ne.s32.totalorder %s5150_s4, 0 }
 0x20c   : > { %s5152_s25 = sld [smem:[#allocation37_spill]] (!%p5151_p4) }
 0x20d   : > { %809 = sbr.rel (%p5151_p4) target bundleno = 5255 (0x1487), region = 92 }
 0x212   : > { %p5153_p8 = scmp.eq.s32.totalorder (!%p5151_p4), %s5152_s25, 0 }
 0x214   : > { %3952 = dma.done.wait (%p5153_p8), [#allocation5], 256   ;;  %p5154_p13 = pmov %p5153_p8 }
 0x215   : > { %p5155_p9 = pmov %p5153_p8 }
 0x216   : > { %3954 = vsyncadd (%p5154_p13), [#allocation5], 4294967040 }
 0x217   : > { %3956 = dma.done.wait (%p5155_p9), [#allocation8], 32   ;;  %p5156_p2 = pmov %p5153_p8 }
 0x219   : > { %3958 = vsyncadd (%p5156_p2), [#allocation8], 4294967264  ;;  %p5157_p5 = pmov %p5156_p2 }
 0x21a   : > { %p5158_p6 = pmov %p5156_p2 }
 0x21b   : > { %3960 = dma.done.wait (%p5157_p5), [#allocation11], 144  }
 0x21c   : > { %3962 = vsyncadd (%p5158_p6), [#allocation11], 4294967152  ;;  %p5159_p7 = pmov %p5156_p2 }
 0x21d   : > { %p5160_p12 = pmov %p5156_p2 }
 0x21e   : > { %3964 = dma.done.wait (%p5159_p7), [#allocation14], 32  }
 0x21f   : > { %3966 = vsyncadd (%p5160_p12), [#allocation14], 4294967264  ;;  %s5161_s24 = sld [smem:[#allocation35_spill]]  ;;  %s5162_s27 = sld [smem:[#allocation40_spill]] }
 0x220   : > { %s835_s28 = sand.u32 1, %s5152_s25  }
 0x221   : > { %s836_s2 = scalar_lea.sflag [#allocation5], %s835_s28 }
 0x225   : > { %s4712_s16 = sand.u32 1, %s5161_s24   ;;  %p5163_p10 = scmp.ne.s32.totalorder %s5162_s27, 0 }
 0x226   : > { %s4715_s7 = sshll.u32 %s4712_s16, 4 }
 0x227   : > { %s839_s26 = scalar_lea.vmem [#allocation15], %s4715_s7 }
 0x228   : > { %3968 = dma.done.wait (%p5163_p10), %s836_s2, 1408  }
 0x229   : > { %3970 = vsyncadd (%p5163_p10), %s836_s2, 4294965888  ;;  %s2884_s29 = sshll.u32 %s4712_s16, 5  ;;  %s2885_s18 = sshll.u32 %s4712_s16, 3 }
 0x22a   : > { %s847_s0 = scalar_lea.vmem [#allocation16], %s4712_s16  ;;  %s856_s9 = scalar_lea.vmem [#allocation17], %s4715_s7 }
 0x22b   : > { %s864_s20 = scalar_lea.vmem [#allocation18], %s4712_s16  ;;  %s872_s1 = scalar_lea.vmem [#allocation19], %s4712_s16 }
 0x22c   : > { %s880_s19 = scalar_lea.vmem [#allocation20], %s4712_s16  ;;  %s889_s5 = scalar_lea.vmem [#allocation21], %s4715_s7 }
 0x22d   : > { %s897_s17 = scalar_lea.vmem [#allocation22], %s4712_s16  ;;  %s4731_s4 = scalar_lea.vmem [#allocation23], %s2884_s29 }
 0x22e   : > { %s914_s24 = scalar_lea.vmem [#allocation24], %s4712_s16  ;;  %s922_s27 = scalar_lea.vmem [#allocation25], %s4712_s16 }
 0x22f   : > { %s930_s28 = scalar_lea.vmem [#allocation26], %s4712_s16  ;;  %s4736_s2 = scalar_lea.vmem [#allocation27], %s2885_s18 }
 0x230   : > { %p5164_p1 = scmp.ne.s32.totalorder %s5152_s25, 0 }
 0x231   : > { %v1035_v0 = vld [vmem:[#allocation4] sm:$0xff] (!%p5164_p1)  ;;  %vm1039_vm0 = vcmask (!%p5164_p1), 130048   ;;  %v1036_v1 = vld [vmem:[#allocation4 + $0x8] sm:$0xff] (!%p5164_p1)  ;;  %v3320_v14 = vld [vmem:[#allocation10] sm:$0xff] (!%p5164_p1)   ;;  %v4013_v15 = vmov (!%p5164_p1), 0.0   ;;  %vm4014_vm1 = vmmov (!%p5164_p1), 0  }
 0x232   : > { %1034 = sbr.rel (%p5164_p1) target bundleno = 1098 (0x44a), region = 168  ;;  %v1040_v2 = vsel (!%p5164_p1), %vm1039_vm0, %v1035_v0, 0.0  ;;  %v1043_v3 = vsel (!%p5164_p1), %vm1039_vm0, %v1036_v1, 0.0  ;;  %2996 = vmatprep.subr.bf16.mxu0 (!%p5164_p1), %v4013_v15  ;;  %2998 = vmatprep.mubr.msk.bf16.mxu0 (!%p5164_p1), %vm4014_vm1, %v4013_v15  ;;  %v2887_v24 = vld [vmem:[#allocation7] ss:$0 sm:$0xff] (!%p5164_p1)  ;;  %vm1143_vm2 = vcmask (!%p5164_p1), 261120  }
 0x233   : > { %1041 = vadd.xlane.f32.xlu0 (!%p5164_p1), %v1040_v2  ;;  %2997 = vmatpush3.bf16.msra.mxu0 (!%p5164_p1), %v3320_v14  ;;  %v2888_v28 = vld [vmem:[#allocation9] ss:$0 sm:$0xff] (!%p5164_p1)  ;;  %v2889_v33 = vld [vmem:[#allocation12] ss:$0 sm:$0xff] (!%p5164_p1) }
 0x237   : > { %1044 = vadd.xlane.f32.xlu0 (!%p5164_p1), %v1043_v3 }
 0x2c0   : > { %v1042_v4 = vpop.xlane.xlu0 %1041 }
 0x2c1   : > { %v1047_v5 = vmul.f32 0.0625, %v1042_v4 }
 0x2c3   : > { %v1049_v6 = vsub.f32 %v1035_v0, %v1047_v5 }
 0x2c4   : > { %v1045_v7 = vpop.xlane.xlu0 %1044 }
 0x2c5   : > { %v1048_v8 = vmul.f32 0.0625, %v1045_v7  ;;  %v1051_v9 = vmul.f32 %v1049_v6, %v1049_v6 }
 0x2c7   : > { %v1050_v10 = vsub.f32 %v1036_v1, %v1048_v8  ;;  %v1053_v11 = vsel %vm1039_vm0, %v1051_v9, 0.0 }
 0x2c8   : > { %1054 = vadd.xlane.f32.xlu1 %v1053_v11 }
 0x2c9   : > { %v1052_v12 = vmul.f32 %v1050_v10, %v1050_v10 }
 0x2cb   : > { %v1056_v13 = vsel %vm1039_vm0, %v1052_v12, 0.0 }
 0x2cc   : > { %1057 = vadd.xlane.f32.xlu1 %v1056_v13 }
 0x355   : > { %v1055_v16 = vpop.xlane.xlu1 %1054 }
 0x356   : > { %v1059_v17 = vmul.f32 0.0625, %v1055_v16 }
 0x358   : > { %v1061_v18 = vadd.f32 1e-12, %v1059_v17 }
 0x359   : > { %v1058_v19 = vpop.xlane.xlu1 %1057 }
 0x35a   : > { %3321 = vrsqrt.f32 %v1061_v18  ;;  %v1060_v20 = vmul.f32 0.0625, %v1058_v19 }
 0x35c   : > { %v1062_v21 = vadd.f32 1e-12, %v1060_v20 }
 0x35e   : > { %3323 = vrsqrt.f32 %v1062_v21 }
 0x364   : > { %v3322_v22 = vpop.eup %3321 }
 0x365   : > { %v1065_v23 = vmul.f32 %v3322_v22, %v1049_v6 }
 0x367   : > { %v1073_v27 = vmul.f32 %v2887_v24, %v1065_v23 }
 0x368   : > { %v3324_v25 = vpop.eup %3323 }
 0x369   : > { %v1066_v26 = vmul.f32 %v3324_v25, %v1050_v10  ;;  %v1081_v30 = vadd.f32 %v2888_v28, %v1073_v27 }
 0x36b   : > { %v1074_v29 = vmul.f32 %v2887_v24, %v1066_v26 }
 0x36d   : > { %v1082_v31 = vadd.f32 %v2888_v28, %v1074_v29 }
 0x36f   : > { %v1083_v32 = vpack.c.bf16 %v1082_v31, %v1081_v30 }
 0x371   : > { %2999 = vmatmul.mubr.msk.bf16.vlgmr.msra.gmra.mrb[0].mxu0 %vm1039_vm0, %v1083_v32 }
 0x444   : > { %v1136_v34 = vpop.f32.mrb[0].mxu0 }
 0x445   : > { %v1137_v35 = vadd.f32 %v2889_v33, %v1136_v34  ;;  %v3000_v36 = vpop.f32.mrb[1].mxu0 }
 0x446   : > { %v1139_v37 = vpop.f32.mrb[2].mxu0 }
 0x447   : > { %1144 = vst.msk [vmem:[#allocation2] sm:$0xff] %vm1143_vm2, %v1137_v35  ;;  %v1140_v38 = vadd.f32 %v2889_v33, %v1139_v37  ;;  %v3001_v39 = vpop.f32.mrb[3].mxu0 }
 0x449   : > { %1145 = vst.msk [vmem:[#allocation2 + $0x8] sm:$0xff] %vm1143_vm2, %v1140_v38 }
 0x44a PF: > { %v3325_v40 = vld [vmem:[%s839_s26] sm:$0xff]   ;;  %v4015_v41 = vmov 0.0   ;;  %v3326_v42 = vld [vmem:[%s839_s26 + $0x8] sm:$0xff]   ;;  %vm4016_vm3 = vmmov 0   ;;  %vm1172_vm4 = vcmask 261120   ;;  %s4017_s25 = smov 96   ;;  %v1225_v61 = vlaneseq }
 0x44b   : > { %3002 = vmatprep.subr.bf16.mxu0 %v4015_v41  ;;  %3010 = vmatprep.subr.bf16.mxu1 %v4015_v41  ;;  %v2892_v46 = vld [vmem:[%s847_s0] ss:$0 sm:$0xff]  ;;  %vm1261_vm5 = vcmask 64512   ;;  %v4018_v59 = vmov 1966171168   ;;  %s4019_s26 = smov 64  }
 0x44c   : > { %3003 = vmatpush3.bf16.msra.mxu0 %v3325_v40  ;;  %3006 = vmatprep.mubr.msk.bf16.mxu0 %vm4016_vm3, %v4015_v41  ;;  %v1223_v60 = vunpack.c.l.s4 %v4018_v59  ;;  %v1218_v62 = vld [vmem:[#allocation13] sm:$0x3]  ;;  %v1226_v1 = vshrl.u32 %v1225_v61, 7  ;;  %s4020_s29 = smov 88   ;;  %vm1385_vm6 = vcmask 1043456   ;;  %s4021_s18 = smov 120  }
 0x44d   : > { %3004 = vmatprep.subr.bf16.mxu0 %v4015_v41  ;;  %3012 = vmatprep.mubr.msk.bf16.mxu1 %vm4016_vm3, %v4015_v41  ;;  %v1219_v63 = vsub.f32 1.0, %v1218_v62  ;;  %s4022_s0 = smov 56   ;;  %vm1704_vm7 = vcmask 130112   ;;  %vm1931_vm8 = vcmask 195712   ;;  %vm2158_vm9 = vcmask 261312   ;;  %s5165_s7 = sld [smem:[#allocation37_spill]] }
 0x44e   : > { %v4753_v43 = vld [vmem:[#allocation2] sm:$0xff]  ;;  %v1224_v0 = vunpack.c.0.s8 %v1223_v60  ;;  %v1251_v6 = vsub.s32 0, %v1226_v1  ;;  %vm2401_vm10 = vcmask 523264   ;;  %vm2502_vm11 = vcmask 257024  }
 0x44f   : > { %v1220_v2 = vmul.f32 -10000.0, %v1219_v63 }
 0x450   : > { %v4755_v44 = vld [vmem:[#allocation2 + $0x8] sm:$0xff]  ;;  %3005 = vmatpush3.bf16.msra.mxu0 %v3326_v42  ;;  %v1227_v3 = vsub.s32 %v1224_v0, %v1226_v1 }
 0x451   : > { %v1148_v45 = vpack.c.bf16 %v4755_v44, %v4753_v43  ;;  %3016 = vmatprep.subr.bf16.mxu0 %v4015_v41 }
 0x452   : > { %v1228_v4 = vrot.slane %v1220_v2, %v1227_v3 }
 0x453   : > { %3007 = vmatmul.mubr.msk.bf16.vlgmr.msra.gmra.mrb[0].mxu0 %vm1172_vm4, %v1148_v45 }
 0x454   : > { %3018 = vmatprep.mubr.msk.bf16.mxu0 %vm4016_vm3, %v4015_v41  ;;  %v1236_v5 = vrot.slane %v1228_v4, %v1227_v3  ;;  %v1229_v7 = vcombine.high %v1228_v4, %v1228_v4 }
 0x456   : > { %v4786_v8 = vrot.slane %v1236_v5, %v1251_v6  ;;  %v1243_v9 = vrot.slane %v1229_v7, %v1227_v3 }
 0x458   : > { %v4789_v13 = vrot.slane %v1243_v9, %v1251_v6 }
 0x526   : > { %v1210_v47 = vpop.f32.mrb[0].mxu0 }
 0x527   : > { %v1211_v48 = vadd.f32 %v2892_v46, %v1210_v47  ;;  %v3008_v49 = vpop.f32.mrb[1].mxu0 }
 0x528   : > { %v1213_v50 = vpop.f32.mrb[2].mxu0 }
 0x529   : > { %v4768_v51 = vpack.c.bf16 %v1211_v48, %v1211_v48  ;;  %v1214_v52 = vadd.f32 %v2892_v46, %v1213_v50  ;;  %v3009_v53 = vpop.f32.mrb[3].mxu0 }
 0x52b   : > { %1259 = vrot.lane.b32.xlu0 %v4768_v51, %s4017_s25  ;;  %v4771_v54 = vpack.c.bf16 %v1214_v52, %v1214_v52 }
 0x52f   : > { %1308 = vrot.lane.b32.xlu0 %v4771_v54, %s4017_s25  ;;  %s4023_s25 = smov 80  }
 0x59d   : > { %v1260_v55 = vpop.permute.xlu0 %1259 }
 0x59e   : > { %v1266_v56 = vsel %vm1261_vm5, %v1260_v55, 0 }
 0x59f   : > { %3011 = vmatpush3.bf16.xpose.msra.mxu1 %v1266_v56 }
 0x5a0   : > { %3022 = vmatprep.subr.bf16.mxu1 %v4015_v41 }
 0x5a1   : > { %v1309_v57 = vpop.permute.xlu0 %1308 }
 0x5a2   : > { %v1314_v58 = vsel %vm1261_vm5, %v1309_v57, 0 }
 0x5a3   : > { %3017 = vmatpush3.bf16.xpose.msra.mxu0 %v1314_v58 }
 0x5a4   : > { %3028 = vmatprep.subr.bf16.mxu0 %v4015_v41 }
 0x5a6   : > { %3013 = vmatmul.mubr.msk.bf16.vlgmr.msra.gmra.mrb[0].mxu1 %vm1261_vm5, %v4768_v51 }
 0x5a7   : > { %3024 = vmatprep.mubr.msk.bf16.mxu1 %vm4016_vm3, %v4015_v41 }
 0x5aa   : > { %3019 = vmatmul.mubr.msk.bf16.vlgmr.msra.gmra.mrb[4].mxu0 %vm1261_vm5, %v4771_v54 }
 0x5ab   : > { %3030 = vmatprep.mubr.msk.bf16.mxu0 %vm4016_vm3, %v4015_v41 }
 0x679   : > { %v1302_v10 = vpop.f32.mrb[0].mxu1 }
 0x67a   : > { %v1303_v11 = vadd.f32 %v1302_v10, %v4786_v8  ;;  %v3014_v12 = vpop.f32.mrb[1].mxu1 }
 0x67b   : > { %v1305_v14 = vpop.f32.mrb[2].mxu1 }
 0x67c   : > { %v3015_v15 = vpop.f32.mrb[3].mxu1  ;;  %v1356_v16 = vsel %vm1261_vm5, %v1303_v11, -inf }
 0x67d   : > { %1357 = vmax.xlane.f32.xlu1 %v1356_v16  ;;  %v1350_v17 = vpop.f32.mrb[4].mxu0 }
 0x67e   : > { %v1351_v18 = vadd.f32 %v1350_v17, %v4789_v13  ;;  %v3020_v19 = vpop.f32.mrb[5].mxu0 }
 0x67f   : > { %v1353_v20 = vpop.f32.mrb[6].mxu0 }
 0x680   : > { %v3021_v21 = vpop.f32.mrb[7].mxu0  ;;  %v1359_v22 = vsel %vm1261_vm5, %v1351_v18, -inf }
 0x681   : > { %1360 = vmax.xlane.f32.xlu1 %v1359_v22 }
 0x692   : > { %1380 = vrot.lane.b32.xlu1 %v4768_v51, %s4019_s26 }
 0x696   : > { %1429 = vrot.lane.b32.xlu1 %v4771_v54, %s4019_s26 }
 0x69a   : > { %1481 = vrot.lane.b32.xlu1 %v4768_v51, %s4020_s29 }
 0x70a   : > { %v1358_v23 = vpop.xlane.xlu1 %1357 }
 0x70b   : > { %v1362_v24 = vsub.f32 %v1303_v11, %v1358_v23 }
 0x70d   : > { %v1364_v25 = vmul.f32 1.442695, %v1362_v24 }
 0x70e   : > { %v1361_v26 = vpop.xlane.xlu1 %1360 }
 0x70f   : > { %3335 = vpow2.f32 %v1364_v25  ;;  %v1363_v27 = vsub.f32 %v1351_v18, %v1361_v26 }
 0x711   : > { %v1366_v28 = vmul.f32 1.442695, %v1363_v27 }
 0x712   : > { %v1381_v29 = vpop.permute.xlu1 %1380 }
 0x713   : > { %3337 = vpow2.f32 %v1366_v28  ;;  %v1387_v30 = vsel %vm1385_vm6, %v1381_v29, 0 }
 0x714   : > { %3023 = vmatpush3.bf16.msra.mxu1 %v1387_v30 }
 0x715   : > { %3034 = vmatprep.subr.bf16.mxu1 %v4015_v41 }
 0x716   : > { %v1430_v31 = vpop.permute.xlu1 %1429 }
 0x717   : > { %v1435_v32 = vsel %vm1385_vm6, %v1430_v31, 0 }
 0x718   : > { %3029 = vmatpush3.bf16.msra.mxu0 %v1435_v32 }
 0x719   : > { %v3336_v33 = vpop.eup %3335  ;;  %3040 = vmatprep.subr.bf16.mxu0 %v4015_v41 }
 0x71a   : > { %v1368_v34 = vsel %vm1261_vm5, %v3336_v33, 0.0  ;;  %v1482_v37 = vpop.permute.xlu1 %1481 }
 0x71b   : > { %1369 = vadd.xlane.f32.xlu0 %v1368_v34  ;;  %v1487_v47 = vsel %vm1261_vm5, %v1482_v37, 0 }
 0x71d   : > { %v3338_v35 = vpop.eup %3337 }
 0x71e   : > { %v1371_v36 = vsel %vm1261_vm5, %v3338_v35, 0.0 }
 0x71f   : > { %1372 = vadd.xlane.f32.xlu1 %v1371_v36 }
 0x730   : > { %1531 = vrot.lane.b32.xlu1 %v4771_v54, %s4020_s29  ;;  %s4024_s29 = smov 112  }
 0x731   : > { %1479 = vrot.lane.b32.xlu0 %v4768_v51, %s4021_s18 }
 0x734   : > { %1529 = vrot.lane.b32.xlu1 %v4771_v54, %s4021_s18  ;;  %s4025_s18 = smov 48  }
 0x7a8   : > { %v1370_v38 = vpop.xlane.xlu0 %1369 }
 0x7a9   : > { %3339 = vrcp.f32 %v1370_v38 }
 0x7ac   : > { %v1373_v39 = vpop.xlane.xlu1 %1372  ;;  %v1480_v53 = vpop.permute.xlu0 %1479 }
 0x7ad   : > { %3341 = vrcp.f32 %v1373_v39 }
 0x7b0   : > { %v1532_v49 = vpop.permute.xlu1 %1531 }
 0x7b1   : > { %v1537_v52 = vsel %vm1261_vm5, %v1532_v49, 0 }
 0x7b3   : > { %v3340_v40 = vpop.eup %3339 }
 0x7b4   : > { %v1376_v42 = vmul.f32 %v3340_v40, %v3336_v33  ;;  %v1530_v55 = vpop.permute.xlu1 %1529 }
 0x7b6   : > { %v1378_v45 = vpack.c.bf16 %v1376_v42, %v1376_v42 }
 0x7b7   : > { %v3342_v46 = vpop.eup %3341 }
 0x7b8   : > { %v1377_v48 = vmul.f32 %v3342_v46, %v3338_v35  ;;  %3025 = vmatmul.mubr.msk.bf16.vlgmr.msra.gmra.mrb[4].mxu1 %vm1261_vm5, %v1378_v45 }
 0x7b9   : > { %3035 = vmatpush3.bf16.xpose.msra.mxu1 %v1487_v47  ;;  %3036 = vmatprep.mubr.msk.bf16.mxu1 %vm4016_vm3, %v4015_v41 }
 0x7ba   : > { %v1379_v50 = vpack.c.bf16 %v1377_v48, %v1377_v48  ;;  %3046 = vmatprep.subr.bf16.mxu1 %v4015_v41 }
 0x7bc   : > { %3031 = vmatmul.mubr.msk.bf16.vlgmr.msra.gmra.mrb[8].mxu0 %vm1261_vm5, %v1379_v50 }
 0x7bd   : > { %3041 = vmatpush3.bf16.xpose.msra.mxu0 %v1537_v52  ;;  %3042 = vmatprep.mubr.msk.bf16.mxu0 %vm4016_vm3, %v4015_v41 }
 0x7be   : > { %3052 = vmatprep.subr.bf16.mxu0 %v4015_v41 }
 0x7c0   : > { %3037 = vmatmul.mubr.msk.bf16.vlgmr.msra.gmra.mrb[8].mxu1 %vm1261_vm5, %v1480_v53 }
 0x7c1   : > { %3048 = vmatprep.mubr.msk.bf16.mxu1 %vm4016_vm3, %v4015_v41 }
 0x7c4   : > { %3043 = vmatmul.mubr.msk.bf16.vlgmr.msra.gmra.mrb[12].mxu0 %vm1261_vm5, %v1530_v55 }
 0x7c5   : > { %3054 = vmatprep.mubr.msk.bf16.mxu0 %vm4016_vm3, %v4015_v41 }
 0x88b   : > { %v1423_v56 = vpop.f32.mrb[4].mxu1 }
 0x88c   : > { %v3026_v57 = vpop.f32.mrb[5].mxu1 }
 0x88d   : > { %v1426_v58 = vpop.f32.mrb[6].mxu1 }
 0x88e   : > { %v3027_v59 = vpop.f32.mrb[7].mxu1 }
 0x88f   : > { %v1471_v60 = vpop.f32.mrb[8].mxu0 }
 0x890   : > { %v1477_v61 = vpack.c.bf16 %v1471_v60, %v1423_v56  ;;  %v3032_v62 = vpop.f32.mrb[9].mxu0 }
 0x891   : > { %v1474_v63 = vpop.f32.mrb[10].mxu0 }
 0x892   : > { %1478 = vst.msk [vmem:[#allocation3] sm:$0xff] %vm1261_vm5, %v1477_v61  ;;  %v3033_v0 = vpop.f32.mrb[11].mxu0 }
 0x893   : > { %v1523_v1 = vpop.f32.mrb[8].mxu1 }
 0x894   : > { %v1524_v2 = vadd.f32 %v1523_v1, %v4786_v8  ;;  %v3038_v3 = vpop.f32.mrb[9].mxu1 }
 0x895   : > { %v1526_v4 = vpop.f32.mrb[10].mxu1 }
 0x896   : > { %v3039_v5 = vpop.f32.mrb[11].mxu1  ;;  %v1579_v6 = vsel %vm1261_vm5, %v1524_v2, -inf }
 0x897   : > { %1580 = vmax.xlane.f32.xlu1 %v1579_v6  ;;  %v1573_v7 = vpop.f32.mrb[12].mxu0 }
 0x898   : > { %v1574_v9 = vadd.f32 %v1573_v7, %v4789_v13  ;;  %v3044_v10 = vpop.f32.mrb[13].mxu0 }
 0x899   : > { %v1576_v11 = vpop.f32.mrb[14].mxu0 }
 0x89a   : > { %v3045_v12 = vpop.f32.mrb[15].mxu0  ;;  %v1582_v14 = vsel %vm1261_vm5, %v1574_v9, -inf }
 0x89b   : > { %1583 = vmax.xlane.f32.xlu0 %v1582_v14 }
 0x8a8   : > { %1603 = vrot.lane.b32.xlu1 %v4768_v51, %s4022_s0 }
 0x8ac   : > { %1708 = vrot.lane.b32.xlu1 %v4768_v51, %s4023_s25 }
 0x8b1   : > { %1651 = vrot.lane.b32.xlu0 %v4771_v54, %s4022_s0  ;;  %s4026_s0 = smov 72  }
 0x8b5   : > { %1706 = vrot.lane.b32.xlu0 %v4768_v51, %s4024_s29 }
 0x924   : > { %v1581_v15 = vpop.xlane.xlu1 %1580 }
 0x925   : > { %v1585_v16 = vsub.f32 %v1524_v2, %v1581_v15 }
 0x927   : > { %v1587_v17 = vmul.f32 1.442695, %v1585_v16 }
 0x928   : > { %v1604_v18 = vpop.permute.xlu1 %1603  ;;  %v1584_v19 = vpop.xlane.xlu0 %1583 }
 0x929   : > { %3343 = vpow2.f32 %v1587_v17  ;;  %v1609_v20 = vsel %vm1385_vm6, %v1604_v18, 0  ;;  %v1586_v21 = vsub.f32 %v1574_v9, %v1584_v19 }
 0x92a   : > { %3047 = vmatpush3.bf16.msra.mxu1 %v1609_v20 }
 0x92b   : > { %v1589_v22 = vmul.f32 1.442695, %v1586_v21  ;;  %3058 = vmatprep.subr.bf16.mxu1 %v4015_v41 }
 0x92c   : > { %v1652_v23 = vpop.permute.xlu0 %1651  ;;  %v1709_v29 = vpop.permute.xlu1 %1708 }
 0x92d   : > { %3345 = vpow2.f32 %v1589_v22  ;;  %v1657_v24 = vsel %vm1385_vm6, %v1652_v23, 0  ;;  %v1714_v36 = vsel %vm1261_vm5, %v1709_v29, 0 }
 0x92e   : > { %3053 = vmatpush3.bf16.msra.mxu0 %v1657_v24 }
 0x92f   : > { %3064 = vmatprep.subr.bf16.mxu0 %v4015_v41 }
 0x930   : > { %v1707_v42 = vpop.permute.xlu0 %1706 }
 0x933   : > { %v3344_v25 = vpop.eup %3343 }
 0x934   : > { %v1591_v26 = vsel %vm1261_vm5, %v3344_v25, 0.0 }
 0x935   : > { %1592 = vadd.xlane.f32.xlu1 %v1591_v26 }
 0x937   : > { %v3346_v27 = vpop.eup %3345 }
 0x938   : > { %v1594_v28 = vsel %vm1261_vm5, %v3346_v27, 0.0 }
 0x939   : > { %1595 = vadd.xlane.f32.xlu1 %v1594_v28 }
 0x94a   : > { %1758 = vrot.lane.b32.xlu1 %v4771_v54, %s4023_s25  ;;  %s4027_s25 = smov 104  }
 0x94e   : > { %1756 = vrot.lane.b32.xlu1 %v4771_v54, %s4024_s29  ;;  %s4028_s29 = smov 40  }
 0x9c2   : > { %v1593_v30 = vpop.xlane.xlu1 %1592 }
 0x9c3   : > { %3347 = vrcp.f32 %v1593_v30 }
 0x9c6   : > { %v1596_v31 = vpop.xlane.xlu1 %1595 }
 0x9c7   : > { %3349 = vrcp.f32 %v1596_v31 }
 0x9ca   : > { %v1759_v38 = vpop.permute.xlu1 %1758 }
 0x9cb   : > { %v1764_v40 = vsel %vm1261_vm5, %v1759_v38, 0 }
 0x9cd   : > { %v3348_v32 = vpop.eup %3347 }
 0x9ce   : > { %v1599_v33 = vmul.f32 %v3348_v32, %v3344_v25  ;;  %v1757_v45 = vpop.permute.xlu1 %1756 }
 0x9d0   : > { %v1601_v34 = vpack.c.bf16 %v1599_v33, %v1599_v33 }
 0x9d1   : > { %v3350_v35 = vpop.eup %3349 }
 0x9d2   : > { %v1600_v37 = vmul.f32 %v3350_v35, %v3346_v27  ;;  %3049 = vmatmul.mubr.msk.bf16.vlgmr.msra.gmra.mrb[12].mxu1 %vm1261_vm5, %v1601_v34 }
 0x9d3   : > { %3059 = vmatpush3.bf16.xpose.msra.mxu1 %v1714_v36  ;;  %3060 = vmatprep.mubr.msk.bf16.mxu1 %vm4016_vm3, %v4015_v41 }
 0x9d4   : > { %v1602_v39 = vpack.c.bf16 %v1600_v37, %v1600_v37  ;;  %3070 = vmatprep.subr.bf16.mxu1 %v4015_v41 }
 0x9d6   : > { %3055 = vmatmul.mubr.msk.bf16.vlgmr.msra.gmra.mrb[16].mxu0 %vm1261_vm5, %v1602_v39 }
 0x9d7   : > { %3065 = vmatpush3.bf16.xpose.msra.mxu0 %v1764_v40  ;;  %3066 = vmatprep.mubr.msk.bf16.mxu0 %vm4016_vm3, %v4015_v41 }
 0x9d8   : > { %3076 = vmatprep.subr.bf16.mxu0 %v4015_v41 }
 0x9da   : > { %3061 = vmatmul.mubr.msk.bf16.vlgmr.msra.gmra.mrb[16].mxu1 %vm1261_vm5, %v1707_v42 }
 0x9db   : > { %3072 = vmatprep.mubr.msk.bf16.mxu1 %vm4016_vm3, %v4015_v41 }
 0x9de   : > { %3067 = vmatmul.mubr.msk.bf16.vlgmr.msra.gmra.mrb[20].mxu0 %vm1261_vm5, %v1757_v45 }
 0x9df   : > { %3078 = vmatprep.mubr.msk.bf16.mxu0 %vm4016_vm3, %v4015_v41 }
 0xaa5   : > { %v4857_v46 = vpop.f32.mrb[12].mxu1 }
 0xaa6   : > { %v3050_v47 = vpop.f32.mrb[13].mxu1 }
 0xaa7   : > { %v1648_v48 = vpop.f32.mrb[14].mxu1 }
 0xaa8   : > { %v3051_v49 = vpop.f32.mrb[15].mxu1 }
 0xaa9   : > { %v4859_v50 = vpop.f32.mrb[16].mxu0 }
 0xaaa   : > { %v1699_v52 = vpack.c.bf16 %v4859_v50, %v4857_v46  ;;  %v3056_v53 = vpop.f32.mrb[17].mxu0 }
 0xaab   : > { %v1696_v55 = vpop.f32.mrb[18].mxu0 }
 0xaac   : > { %v3057_v56 = vpop.f32.mrb[19].mxu0 }
 0xaad   : > { %v1750_v57 = vpop.f32.mrb[16].mxu1 }
 0xaae   : > { %v1751_v58 = vadd.f32 %v1750_v57, %v4786_v8  ;;  %v3062_v59 = vpop.f32.mrb[17].mxu1 }
 0xaaf   : > { %v1753_v60 = vpop.f32.mrb[18].mxu1 }
 0xab0   : > { %v3063_v61 = vpop.f32.mrb[19].mxu1  ;;  %v1806_v62 = vsel %vm1261_vm5, %v1751_v58, -inf }
 0xab1   : > { %1807 = vmax.xlane.f32.xlu0 %v1806_v62  ;;  %v1800_v63 = vpop.f32.mrb[20].mxu0 }
 0xab2   : > { %v1801_v0 = vadd.f32 %v1800_v63, %v4789_v13  ;;  %v3068_v1 = vpop.f32.mrb[21].mxu0 }
 0xab3   : > { %v1803_v2 = vpop.f32.mrb[22].mxu0 }
 0xab4   : > { %v3069_v3 = vpop.f32.mrb[23].mxu0  ;;  %v1809_v4 = vsel %vm1261_vm5, %v1801_v0, -inf }
 0xab5   : > { %1810 = vmax.xlane.f32.xlu1 %v1809_v4 }
 0xac6   : > { %1830 = vrot.lane.b32.xlu1 %v4768_v51, %s4025_s18 }
 0xaca   : > { %1935 = vrot.lane.b32.xlu1 %v4768_v51, %s4026_s0 }
 0xace   : > { %1985 = vrot.lane.b32.xlu1 %v4771_v54, %s4026_s0  ;;  %s4030_s0 = smov 16  }
 0xad2   : > { %1983 = vrot.lane.b32.xlu1 %v4771_v54, %s4027_s25 }
 0xb3e   : > { %v1808_v5 = vpop.xlane.xlu0 %1807 }
 0xb3f   : > { %v1812_v6 = vsub.f32 %v1751_v58, %v1808_v5 }
 0xb41   : > { %v1814_v7 = vmul.f32 1.442695, %v1812_v6 }
 0xb42   : > { %v1811_v9 = vpop.xlane.xlu1 %1810 }
 0xb43   : > { %3351 = vpow2.f32 %v1814_v7  ;;  %v1813_v10 = vsub.f32 %v1801_v0, %v1811_v9 }
 0xb45   : > { %v1816_v11 = vmul.f32 1.442695, %v1813_v10 }
 0xb46   : > { %v1831_v12 = vpop.permute.xlu1 %1830 }
 0xb47   : > { %3353 = vpow2.f32 %v1816_v11  ;;  %v1836_v14 = vsel %vm1385_vm6, %v1831_v12, 0 }
 0xb48   : > { %3071 = vmatpush3.bf16.msra.mxu1 %v1836_v14 }
 0xb49   : > { %3082 = vmatprep.subr.bf16.mxu1 %v4015_v41 }
 0xb4a   : > { %v1936_v24 = vpop.permute.xlu1 %1935 }
 0xb4b   : > { %v1941_v28 = vsel %vm1261_vm5, %v1936_v24, 0 }
 0xb4d   : > { %v3352_v15 = vpop.eup %3351 }
 0xb4e   : > { %v1818_v16 = vsel %vm1261_vm5, %v3352_v15, 0.0  ;;  %v1986_v30 = vpop.permute.xlu1 %1985 }
 0xb4f   : > { %1819 = vadd.xlane.f32.xlu0 %v1818_v16  ;;  %v1991_v32 = vsel %vm1261_vm5, %v1986_v30, 0 }
 0xb51   : > { %v3354_v17 = vpop.eup %3353 }
 0xb52   : > { %v1821_v18 = vsel %vm1261_vm5, %v3354_v17, 0.0  ;;  %v1984_v34 = vpop.permute.xlu1 %1983 }
 0xb53   : > { %1822 = vadd.xlane.f32.xlu0 %v1821_v18 }
 0xb69   : > { %1878 = vrot.lane.b32.xlu0 %v4771_v54, %s4025_s18  ;;  %s4029_s18 = smov 8  }
 0xb6d   : > { %1933 = vrot.lane.b32.xlu0 %v4768_v51, %s4027_s25  ;;  %s4031_s25 = smov 24  }
 0xbdc   : > { %v1820_v19 = vpop.xlane.xlu0 %1819 }
 0xbdd   : > { %3355 = vrcp.f32 %v1820_v19  ;;  %v3327_v19 = vld [vmem:[%s856_s9] sm:$0xff]  }
 0xbe0   : > { %v1823_v20 = vpop.xlane.xlu0 %1822 }
 0xbe1   : > { %3357 = vrcp.f32 %v1823_v20  ;;  %v3328_v20 = vld [vmem:[%s856_s9 + $0x8] sm:$0xff]   ;;  %s5166_s9 = sld [smem:[#allocation41_spill]] }
 0xbe4   : > { %v1879_v21 = vpop.permute.xlu0 %1878 }
 0xbe5   : > { %v1884_v22 = vsel %vm1385_vm6, %v1879_v21, 0 }
 0xbe6   : > { %3077 = vmatpush3.bf16.msra.mxu0 %v1884_v22 }
 0xbe7   : > { %v3356_v23 = vpop.eup %3355  ;;  %3088 = vmatprep.subr.bf16.mxu0 %v4015_v41  ;;  %p5168_p0 = scmp.ne.s32.totalorder %s5166_s9, 0 }
 0xbe8   : > { %v1826_v25 = vmul.f32 %v3356_v23, %v3352_v15  ;;  %v1934_v33 = vpop.permute.xlu0 %1933 }
 0xbea   : > { %v1828_v26 = vpack.c.bf16 %v1826_v25, %v1826_v25 }
 0xbeb   : > { %v3358_v27 = vpop.eup %3357 }
 0xbec   : > { %v1827_v29 = vmul.f32 %v3358_v27, %v3354_v17  ;;  %3073 = vmatmul.mubr.msk.bf16.vlgmr.msra.gmra.mrb[20].mxu1 %vm1261_vm5, %v1828_v26 }
 0xbed   : > { %3083 = vmatpush3.bf16.xpose.msra.mxu1 %v1941_v28  ;;  %3084 = vmatprep.mubr.msk.bf16.mxu1 %vm4016_vm3, %v4015_v41 }
 0xbee   : > { %v1829_v31 = vpack.c.bf16 %v1827_v29, %v1827_v29  ;;  %3094 = vmatprep.subr.bf16.mxu1 %v4015_v41 }
 0xbf0   : > { %3079 = vmatmul.mubr.msk.bf16.vlgmr.msra.gmra.mrb[24].mxu0 %vm1261_vm5, %v1829_v31 }
 0xbf1   : > { %3089 = vmatpush3.bf16.xpose.msra.mxu0 %v1991_v32  ;;  %3090 = vmatprep.mubr.msk.bf16.mxu0 %vm4016_vm3, %v4015_v41  ;;  %v2914_v32 = vld [vmem:[%s864_s20] ss:$0 sm:$0xff]  ;;  %s2947_s20 = sshll.u32 %s5165_s7, 7 }
 0xbf2   : > { %3100 = vmatprep.subr.bf16.mxu0 %v4015_v41 }
 0xbf4   : > { %3085 = vmatmul.mubr.msk.bf16.vlgmr.msra.gmra.mrb[24].mxu1 %vm1261_vm5, %v1934_v33 }
 0xbf5   : > { %3096 = vmatprep.mubr.msk.bf16.mxu1 %vm4016_vm3, %v4015_v41 }
 0xbf8   : > { %3091 = vmatmul.mubr.msk.bf16.vlgmr.msra.gmra.mrb[28].mxu0 %vm1261_vm5, %v1984_v34 }
 0xbf9   : > { %3102 = vmatprep.mubr.msk.bf16.mxu0 %vm4016_vm3, %v4015_v41 }
 0xcbf   : > { %v1872_v35 = vpop.f32.mrb[20].mxu1 }
 0xcc0   : > { %v3074_v36 = vpop.f32.mrb[21].mxu1 }
 0xcc1   : > { %v1875_v37 = vpop.f32.mrb[22].mxu1 }
 0xcc2   : > { %v3075_v38 = vpop.f32.mrb[23].mxu1 }
 0xcc3   : > { %v1920_v39 = vpop.f32.mrb[24].mxu0 }
 0xcc4   : > { %v1926_v40 = vpack.c.bf16 %v1920_v39, %v1872_v35  ;;  %v3080_v42 = vpop.f32.mrb[25].mxu0 }
 0xcc5   : > { %v1923_v45 = vpop.f32.mrb[26].mxu0 }
 0xcc6   : > { %v3081_v47 = vpop.f32.mrb[27].mxu0 }
 0xcc7   : > { %v1977_v48 = vpop.f32.mrb[24].mxu1 }
 0xcc8   : > { %v1978_v49 = vadd.f32 %v1977_v48, %v4786_v8  ;;  %v3086_v53 = vpop.f32.mrb[25].mxu1 }
 0xcc9   : > { %v1980_v55 = vpop.f32.mrb[26].mxu1 }
 0xcca   : > { %v3087_v56 = vpop.f32.mrb[27].mxu1  ;;  %v2033_v57 = vsel %vm1261_vm5, %v1978_v49, -inf }
 0xccb   : > { %2034 = vmax.xlane.f32.xlu0 %v2033_v57  ;;  %v2027_v58 = vpop.f32.mrb[28].mxu0 }
 0xccc   : > { %v2028_v59 = vadd.f32 %v2027_v58, %v4789_v13  ;;  %v3092_v60 = vpop.f32.mrb[29].mxu0 }
 0xccd   : > { %v2030_v61 = vpop.f32.mrb[30].mxu0  ;;  %v3330_v60 = vld [vmem:[%s889_s5 + $0x8] sm:$0xff]  }
 0xcce   : > { %v3093_v62 = vpop.f32.mrb[31].mxu0  ;;  %v2036_v63 = vsel %vm1261_vm5, %v2028_v59, -inf }
 0xccf   : > { %2037 = vmax.xlane.f32.xlu1 %v2036_v63 }
 0xce0   : > { %2057 = vrot.lane.b32.xlu1 %v4768_v51, %s4028_s29 }
 0xce4   : > { %1701 = vrot.lane.b32.xlu1 %v1699_v52, %s4029_s18 }
 0xce8   : > { %1928 = vrot.lane.b32.xlu1 %v1926_v40, %s4030_s0 }
 0xd58   : > { %v2035_v8 = vpop.xlane.xlu0 %2034 }
 0xd59   : > { %v2039_v0 = vsub.f32 %v1978_v49, %v2035_v8 }
 0xd5b   : > { %v2041_v1 = vmul.f32 1.442695, %v2039_v0 }
 0xd5c   : > { %v2038_v13 = vpop.xlane.xlu1 %2037 }
 0xd5d   : > { %3359 = vpow2.f32 %v2041_v1  ;;  %v2040_v2 = vsub.f32 %v2028_v59, %v2038_v13 }
 0xd5f   : > { %v2043_v3 = vmul.f32 1.442695, %v2040_v2  ;;  %v2918_v2 = vld [vmem:[%s872_s1] ss:$0 sm:$0xff]  ;;  %s2519_s1 = sshll.u32 %s4736_s2, 4  ;;  %s4972_s1 = int_to_ptr.vmem [resolvable:$true] %s2519_s1 }
 0xd60   : > { %v2058_v4 = vpop.permute.xlu1 %2057 }
 0xd61   : > { %3361 = vpow2.f32 %v2043_v3  ;;  %v2063_v5 = vsel %vm1385_vm6, %v2058_v4, 0 }
 0xd62   : > { %3095 = vmatpush3.bf16.msra.mxu1 %v2063_v5 }
 0xd63   : > { %3106 = vmatprep.subr.bf16.mxu1 %v4015_v41 }
 0xd64   : > { %v1702_v51 = vpop.permute.xlu1 %1701 }
 0xd65   : > { %1705 = vst.msk [vmem:[#allocation3] sm:$0xff] %vm1704_vm7, %v1702_v51 }
 0xd67   : > { %v3360_v46 = vpop.eup %3359 }
 0xd68   : > { %v1929_v50 = vpop.permute.xlu1 %1928  ;;  %v2045_v52 = vsel %vm1261_vm5, %v3360_v46, 0.0 }
 0xd69   : > { %1932 = vst.msk [vmem:[#allocation3] sm:$0xff] %vm1931_vm8, %v1929_v50  ;;  %2046 = vadd.xlane.f32.xlu0 %v2045_v52 }
 0xd6b   : > { %v3362_v6 = vpop.eup %3361 }
 0xd6c   : > { %v2048_v7 = vsel %vm1261_vm5, %v3362_v6, 0.0 }
 0xd6d   : > { %2049 = vadd.xlane.f32.xlu0 %v2048_v7 }
 0xd83   : > { %2105 = vrot.lane.b32.xlu0 %v4771_v54, %s4028_s29 }
 0xdf6   : > { %v2047_v9 = vpop.xlane.xlu0 %2046 }
 0xdf7   : > { %3363 = vrcp.f32 %v2047_v9  ;;  %v3331_v9 = vld [vmem:[%s4731_s4] sm:$0xff]  }
 0xdfa   : > { %v2050_v10 = vpop.xlane.xlu0 %2049 }
 0xdfb   : > { %3365 = vrcp.f32 %v2050_v10  ;;  %v3332_v10 = vld [vmem:[%s4731_s4 + $0x8] sm:$0xff]  }
 0xdfe   : > { %v2106_v11 = vpop.permute.xlu0 %2105 }
 0xdff   : > { %v2111_v12 = vsel %vm1385_vm6, %v2106_v11, 0  ;;  %v3333_v11 = vld [vmem:[%s4731_s4 + $0x10] sm:$0xff]  }
 0xe00   : > { %3101 = vmatpush3.bf16.msra.mxu0 %v2111_v12  ;;  %v3334_v12 = vld [vmem:[%s4731_s4 + $0x18] sm:$0xff]  }
 0xe01   : > { %v3364_v14 = vpop.eup %3363  ;;  %3114 = vmatprep.subr.bf16.mxu0 %v4015_v41 }
 0xe02   : > { %v2053_v15 = vmul.f32 %v3364_v14, %v3360_v46  ;;  %v2919_v46 = vld [vmem:[%s880_s19] ss:$0 sm:$0xff] }
 0xe03   : > { %v2920_v14 = vld [vmem:[%s897_s17] ss:$0 sm:$0xff]  ;;  %s5167_s17 = sld [smem:[#allocation58_spill]] }
 0xe04   : > { %v2055_v16 = vpack.c.bf16 %v2053_v15, %v2053_v15 }
 0xe05   : > { %v3366_v17 = vpop.eup %3365 }
 0xe06   : > { %v2054_v18 = vmul.f32 %v3366_v17, %v3362_v6  ;;  %3097 = vmatmul.mubr.msk.bf16.vlgmr.msra.gmra.mrb[28].mxu1 %vm1261_vm5, %v2055_v16 }
 0xe07   : > { %3110 = vmatprep.mubr.msk.bf16.mxu1 %vm4016_vm3, %v4015_v41  ;;  %3107 = vmatpush3.bf16.msra.mxu1 %v3327_v19 }
 0xe08   : > { %v2056_v54 = vpack.c.bf16 %v2054_v18, %v2054_v18  ;;  %3108 = vmatprep.subr.bf16.mxu1 %v4015_v41 }
 0xe09   : > { %s4968_s4 = scalar_lea.hbm %s5167_s17, %s2947_s20 }
 0xe0a   : > { %3103 = vmatmul.mubr.msk.bf16.vlgmr.msra.gmra.mrb[32].mxu0 %vm1261_vm5, %v2056_v54 }
 0xe0b   : > { %3118 = vmatprep.mubr.msk.bf16.mxu0 %vm4016_vm3, %v4015_v41  ;;  %3109 = vmatpush3.bf16.msra.mxu1 %v3328_v20 }
 0xe0c   : > { %3122 = vmatprep.subr.bf16.mxu1 %v4015_v41 }
 0xed9   : > { %v2099_v21 = vpop.f32.mrb[28].mxu1 }
 0xeda   : > { %v3098_v22 = vpop.f32.mrb[29].mxu1 }
 0xedb   : > { %v2102_v23 = vpop.f32.mrb[30].mxu1 }
 0xedc   : > { %v3099_v24 = vpop.f32.mrb[31].mxu1 }
 0xedd   : > { %v2147_v25 = vpop.f32.mrb[32].mxu0 }
 0xede   : > { %v2153_v26 = vpack.c.bf16 %v2147_v25, %v2099_v21  ;;  %v3104_v27 = vpop.f32.mrb[33].mxu0 }
 0xedf   : > { %v2150_v28 = vpop.f32.mrb[34].mxu0 }
 0xee0   : > { %2155 = vrot.lane.b32.xlu0 %v2153_v26, %s4031_s25  ;;  %v3105_v29 = vpop.f32.mrb[35].mxu0 }
 0xf52   : > { %v2156_v30 = vpop.permute.xlu0 %2155 }
 0xf53   : > { %2159 = vst.msk [vmem:[#allocation3] sm:$0xff] %vm2158_vm9, %v2156_v30 }
 0xf5a   : > { %v2160_v31 = vld [vmem:[#allocation3] sm:$0xff] }
 0xf5b   : > { %3111 = vmatmul.mubr.msk.bf16.vlgmr.msra.gmra.mrb[32].mxu1 %vm1172_vm4, %v2160_v31 }
 0xf5c   : > { %3130 = vmatprep.mubr.msk.bf16.mxu1 %vm4016_vm3, %v4015_v41  ;;  %3123 = vmatpush3.bf16.msra.mxu1 %v3331_v9 }
 0xf5d   : > { %3124 = vmatprep.subr.bf16.mxu1 %v4015_v41 }
 0xf60   : > { %3125 = vmatpush3.bf16.msra.mxu1 %v3332_v10 }
 0xf61   : > { %3126 = vmatprep.subr.bf16.mxu1 %v4015_v41 }
 0xf64   : > { %3127 = vmatpush3.bf16.msra.mxu1 %v3333_v11 }
 0xf65   : > { %3128 = vmatprep.subr.bf16.mxu1 %v4015_v41 }
 0xf68   : > { %3129 = vmatpush3.bf16.msra.mxu1 %v3334_v12 }
0x102e   : > { %v2221_v33 = vpop.f32.mrb[32].mxu1 }
0x102f   : > { %v2222_v34 = vadd.f32 %v2914_v32, %v2221_v33  ;;  %v3112_v35 = vpop.f32.mrb[33].mxu1 }
0x1030   : > { %v2224_v36 = vpop.f32.mrb[34].mxu1 }
0x1031   : > { %v2225_v37 = vadd.f32 %v2914_v32, %v2224_v36  ;;  %v3113_v38 = vpop.f32.mrb[35].mxu1  ;;  %v2228_v39 = vadd.f32 %v2222_v34, %v4753_v43 }
0x1032   : > { %v2924_v38 = vld [vmem:[%s914_s24] ss:$0 sm:$0xff]  ;;  %s2506_s24 = scalar_lea.sflag [#allocation6], %s4712_s16 }
0x1033   : > { %v2232_v40 = vsel %vm1172_vm4, %v2228_v39, 0.0  ;;  %v2229_v42 = vadd.f32 %v2225_v37, %v4755_v44  ;;  %v3329_v44 = vld [vmem:[%s889_s5] sm:$0xff]  }
0x1034   : > { %2233 = vadd.xlane.f32.xlu1 %v2232_v40  ;;  %3115 = vmatpush3.bf16.msra.mxu0 %v3329_v44 }
0x1035   : > { %v2235_v45 = vsel %vm1172_vm4, %v2229_v42, 0.0  ;;  %3116 = vmatprep.subr.bf16.mxu0 %v4015_v41 }
0x1036   : > { %2236 = vadd.xlane.f32.xlu0 %v2235_v45 }
0x1038   : > { %3117 = vmatpush3.bf16.msra.mxu0 %v3330_v60 }
0x10c1   : > { %v2234_v47 = vpop.xlane.xlu1 %2233 }
0x10c2   : > { %v2239_v48 = vmul.f32 0.03125, %v2234_v47 }
0x10c3   : > { %v2237_v49 = vpop.xlane.xlu0 %2236 }
0x10c4   : > { %v2241_v53 = vsub.f32 %v2228_v39, %v2239_v48  ;;  %v2240_v55 = vmul.f32 0.03125, %v2237_v49 }
0x10c6   : > { %v2242_v56 = vsub.f32 %v2229_v42, %v2240_v55  ;;  %v2243_v57 = vmul.f32 %v2241_v53, %v2241_v53 }
0x10c8   : > { %v2245_v58 = vsel %vm1172_vm4, %v2243_v57, 0.0  ;;  %v2244_v43 = vmul.f32 %v2242_v56, %v2242_v56 }
0x10c9   : > { %2246 = vadd.xlane.f32.xlu0 %v2245_v58 }
0x10ca   : > { %v2248_v59 = vsel %vm1172_vm4, %v2244_v43, 0.0 }
0x10cb   : > { %2249 = vadd.xlane.f32.xlu1 %v2248_v59 }
0x1156   : > { %v2247_v61 = vpop.xlane.xlu0 %2246 }
0x1157   : > { %v2251_v62 = vmul.f32 0.03125, %v2247_v61 }
0x1158   : > { %v2250_v63 = vpop.xlane.xlu1 %2249 }
0x1159   : > { %v2253_v8 = vadd.f32 1e-12, %v2251_v62  ;;  %v2252_v0 = vmul.f32 0.03125, %v2250_v63 }
0x115b   : > { %3367 = vrsqrt.f32 %v2253_v8  ;;  %v2254_v1 = vadd.f32 1e-12, %v2252_v0 }
0x115d   : > { %3369 = vrsqrt.f32 %v2254_v1 }
0x1165   : > { %v3368_v13 = vpop.eup %3367 }
0x1166   : > { %v2257_v3 = vmul.f32 %v3368_v13, %v2241_v53 }
0x1167   : > { %v3370_v4 = vpop.eup %3369 }
0x1168   : > { %v2265_v5 = vmul.f32 %v2918_v2, %v2257_v3  ;;  %v2258_v51 = vmul.f32 %v3370_v4, %v2242_v56 }
0x116a   : > { %v2266_v50 = vmul.f32 %v2918_v2, %v2258_v51  ;;  %v2273_v52 = vadd.f32 %v2919_v46, %v2265_v5  ;;  %v2930_v51 = vld [vmem:[%s922_s27] ss:$0 sm:$0xff]  ;;  %s3907_s27 = scalar_lea.vmem %s4972_s1, 128 }
0x116b   : > { %p3908_p3 = scmp.ne.s32.totalorder %s4972_s1, %s3907_s27 }
0x116c   : > { %v2274_v6 = vadd.f32 %v2919_v46, %v2266_v50 }
0x116d   : > { %p3909_p11 = pnand %p3908_p3, %p5168_p0 }
0x116e   : > { %v2275_v7 = vpack.c.bf16 %v2274_v6, %v2273_v52 }
0x116f   : > { %p3910_p4 = pneg %p3909_p11 }
0x1170   : > { %3119 = vmatmul.mubr.msk.bf16.vlgmr.msra.gmra.mrb[36].mxu0 %vm1172_vm4, %v2275_v7 }
0x1243   : > { %v2336_v15 = vpop.f32.mrb[36].mxu0 }
0x1244   : > { %v2337_v16 = vadd.f32 %v2920_v14, %v2336_v15  ;;  %v3120_v17 = vpop.f32.mrb[37].mxu0 }
0x1245   : > { %v2339_v18 = vpop.f32.mrb[38].mxu0 }
0x1246   : > { %v2345_v54 = vmul.f32 0.044715, %v2337_v16  ;;  %v2340_v19 = vadd.f32 %v2920_v14, %v2339_v18  ;;  %v3121_v20 = vpop.f32.mrb[39].mxu0  ;;  %v2343_v32 = vmul.f32 0.5, %v2337_v16 }
0x1248   : > { %v2347_v21 = vmul.f32 %v2345_v54, %v2337_v16  ;;  %v2346_v22 = vmul.f32 0.044715, %v2340_v19  ;;  %v2344_v33 = vmul.f32 0.5, %v2340_v19 }
0x124a   : > { %v2349_v23 = vmul.f32 %v2347_v21, %v2337_v16  ;;  %v2348_v24 = vmul.f32 %v2346_v22, %v2340_v19 }
0x124c   : > { %v2351_v25 = vadd.f32 %v2349_v23, %v2337_v16  ;;  %v2350_v26 = vmul.f32 %v2348_v24, %v2340_v19 }
0x124e   : > { %v2353_v27 = vmul.f32 0.7978846, %v2351_v25  ;;  %v2352_v28 = vadd.f32 %v2350_v26, %v2340_v19 }
0x1250   : > { %3371 = vtanh.f32 %v2353_v27  ;;  %v2354_v41 = vmul.f32 0.7978846, %v2352_v28 }
0x1252   : > { %3373 = vtanh.f32 %v2354_v41 }
0x125a   : > { %v3372_v29 = vpop.eup %3371 }
0x125b   : > { %v2357_v30 = vadd.f32 1.0, %v3372_v29 }
0x125c   : > { %v3374_v31 = vpop.eup %3373 }
0x125d   : > { %v2358_v34 = vadd.f32 1.0, %v3374_v31  ;;  %v2359_v35 = vmul.f32 %v2357_v30, %v2343_v32 }
0x125f   : > { %v2360_v36 = vmul.f32 %v2358_v34, %v2344_v33 }
0x1261   : > { %v2361_v37 = vpack.c.bf16 %v2360_v36, %v2359_v35 }
0x1263   : > { %3131 = vmatmul.mubr.msk.bf16.vlgmr.msra.gmra.mrb[36].mxu1 %vm2401_vm10, %v2361_v37 }
0x1336   : > { %v2439_v39 = vpop.f32.mrb[36].mxu1 }
0x1337   : > { %v2440_v40 = vadd.f32 %v2924_v38, %v2439_v39  ;;  %v3132_v42 = vpop.f32.mrb[37].mxu1 }
0x1338   : > { %v2442_v45 = vpop.f32.mrb[38].mxu1 }
0x1339   : > { %v2443_v47 = vadd.f32 %v2924_v38, %v2442_v45  ;;  %v3133_v48 = vpop.f32.mrb[39].mxu1  ;;  %v2446_v49 = vadd.f32 %v2440_v40, %v2273_v52  ;;  %v2931_v52 = vld [vmem:[%s930_s28] ss:$0 sm:$0xff]  ;;  %s4032_s28 = smov [#allocation27]  }
0x133a   : > { %s3911_s29 = sshll.u32 %s4032_s28, 4  ;;  %s3912_s29 = int_to_ptr.vmem [resolvable:$false] %s3911_s29 }
0x133b   : > { %v2450_v53 = vsel %vm1172_vm4, %v2446_v49, 0.0  ;;  %v2447_v55 = vadd.f32 %v2443_v47, %v2274_v6  ;;  %s3913_s18 = scalar_lea.vmem %s3912_s29, 256  ;;  %p3914_p8 = scmp.lt.s32.totalorder %s4972_s1, %s3912_s29 }
0x133c   : > { %2451 = vadd.xlane.f32.xlu0 %v2450_v53  ;;  %p3915_p13 = scmp.lt.s32.totalorder %s3913_s18, %s3907_s27 }
0x133d   : > { %v2453_v56 = vsel %vm1172_vm4, %v2447_v55, 0.0 }
0x133e   : > { %2454 = vadd.xlane.f32.xlu1 %v2453_v56  ;;  %p3916_p9 = por %p3915_p13, %p3914_p8 }
0x1340   : > { %p3917_p2 = pnand %p3916_p9, %p3910_p4 }
0x13c9   : > { %v2452_v57 = vpop.xlane.xlu0 %2451 }
0x13ca   : > { %v2456_v58 = vmul.f32 0.03125, %v2452_v57 }
0x13cb   : > { %v2455_v43 = vpop.xlane.xlu1 %2454 }
0x13cc   : > { %v2458_v59 = vsub.f32 %v2446_v49, %v2456_v58  ;;  %v2457_v44 = vmul.f32 0.03125, %v2455_v43 }
0x13ce   : > { %v2459_v60 = vsub.f32 %v2447_v55, %v2457_v44  ;;  %v2460_v61 = vmul.f32 %v2458_v59, %v2458_v59 }
0x13d0   : > { %v2462_v62 = vsel %vm1172_vm4, %v2460_v61, 0.0  ;;  %v2461_v63 = vmul.f32 %v2459_v60, %v2459_v60 }
0x13d1   : > { %2463 = vadd.xlane.f32.xlu0 %v2462_v62 }
0x13d2   : > { %v2465_v8 = vsel %vm1172_vm4, %v2461_v63, 0.0 }
0x13d3   : > { %2466 = vadd.xlane.f32.xlu1 %v2465_v8 }
0x145e   : > { %v2464_v0 = vpop.xlane.xlu0 %2463 }
0x145f   : > { %v2468_v1 = vmul.f32 0.03125, %v2464_v0 }
0x1460   : > { %v2467_v13 = vpop.xlane.xlu1 %2466 }
0x1461   : > { %v2470_v2 = vadd.f32 1e-12, %v2468_v1  ;;  %v2469_v3 = vmul.f32 0.03125, %v2467_v13 }
0x1463   : > { %3375 = vrsqrt.f32 %v2470_v2  ;;  %v2471_v4 = vadd.f32 1e-12, %v2469_v3 }
0x1465   : > { %3377 = vrsqrt.f32 %v2471_v4 }
0x146d   : > { %v3376_v5 = vpop.eup %3375 }
0x146e   : > { %v2474_v46 = vmul.f32 %v3376_v5, %v2458_v59 }
0x146f   : > { %v3378_v50 = vpop.eup %3377 }
0x1470   : > { %v2482_v6 = vmul.f32 %v2930_v51, %v2474_v46  ;;  %v2475_v7 = vmul.f32 %v3378_v50, %v2459_v60 }
0x1472   : > { %v2483_v9 = vmul.f32 %v2930_v51, %v2475_v7  ;;  %v2490_v10 = vadd.f32 %v2931_v52, %v2482_v6 }
0x1474   : > { %v2491_v11 = vadd.f32 %v2931_v52, %v2483_v9  ;;  %2492 = vst.msk [vmem:[#allocation2] sm:$0xff] %vm1172_vm4, %v2490_v10  ;;  %v2945_v12 = vpack.c.bf16 %v2490_v10, %v2490_v10 }
0x1476   : > { %2493 = vst.msk [vmem:[#allocation2 + $0x8] sm:$0xff] %vm1172_vm4, %v2491_v11  ;;  %v2946_v14 = vpack.c.bf16 %v2491_v11, %v2491_v11 }
0x1477   : > { %2503 = vst.msk [vmem:[%s4736_s2] sm:$0xf] %vm2502_vm11, %v2945_v12 }
0x1478   : > { %2504 = vst.msk [vmem:[%s4736_s2 + $0x4] sm:$0xf] %vm2502_vm11, %v2946_v14 }
0x1479   : > { %3920 = shalt.err (!%p3917_p2)
}
0x147a   : > { %s3921_s2 = scalar_lea.hbm %s4968_s4, 128  ;;  %s3925_s7 = scalar_lea.hbm %s5167_s17, 512 }
0x147b   : > { %p3922_p5 = scmp.ne.s32.totalorder %s4968_s4, %s3921_s2  ;;  %p3926_p12 = scmp.lt.u32.totalorder %s4968_s4, %s5167_s17 }
0x147c   : > { %p3927_p10 = scmp.lt.u32.totalorder %s3925_s7, %s3921_s2  ;;  %p3929_p3 = scmp.lt.u32.totalorder %s3921_s2, %s4968_s4 }
0x147d   : > { %p3923_p6 = pnand %p3922_p5, %p5168_p0 }
0x147e   : > { %p3928_p1 = por %p3927_p10, %p3926_p12 }
0x147f   : > { %p3924_p7 = pneg %p3923_p6 }
0x1480   : > { %p3930_p11 = por %p3929_p3, %p3928_p1 }
0x1482   : > { %p3931_p4 = pnand %p3930_p11, %p3924_p7 }
0x1484   : > { %3934 = shalt.err (!%p3931_p4)
}
0x1485   : > { %s4033_s5 = smov 4  }
0x1486   : > { %3182 = dma.vmem_to_hbm [thread:$0]  (%p5168_p0), %s4972_s1, 128, %s4968_s4, %s2506_s24, %s4019_s26, %s4019_s26, %s4033_s5  }
0x1487 PF: > { %s5169_s27 = sld [smem:[#allocation34_spill]]  ;;  %s5170_s28 = sld [smem:[#allocation42_spill]] }
0x1488   : > { %p3257_p8 = scmp.ge.s32.totalorder %s3989_s30, 2 }
0x148d   : > { %s2534_s29 = sand.u32 1, %s5169_s27   ;;  %p5171_p13 = scmp.ne.s32.totalorder %s5170_s28, 0 }
0x148e   : > { %s2535_s18 = scalar_lea.sflag [#allocation6], %s2534_s29 }
0x148f   : > { %p3241_p9 = pnand %p3257_p8, %p5171_p13 }
0x1491   : > { %3972 = dma.done.wait (!%p3241_p9), %s2535_s18, 128  }
0x1492   : > { %3974 = vsyncadd (!%p3241_p9), %s2535_s18, 4294967168  ;;  %s5172_s30 = sld [smem:[#allocation38_spill]]  ;;  %s5173_s27 = sld [smem:[#allocation35_spill]] }
0x1493   : > { %s5174_s28 = sld [smem:[#allocation36_spill]]  ;;  %s5175_s29 = sld [smem:[#allocation39_spill]] }
0x1498   : > { %p32_p2 = scmp.ge.s32.totalorder %s5172_s30, 6  }
0x149a   :  { %34 = sbr.rel (!%p32_p2) target bundleno = 21 (0x15), region = 285 }
0x14a1   :  { %2540 = vsyncpa [#allocation5], 1 }
0x14a2   :  { %2542 = vsyncpa [#allocation5 + $0x1], 1 }
0x14a3   :  { %2543 = vsyncpa [#allocation8], 1 }
0x14a4   :  { %2544 = vsyncpa [#allocation11], 1 }
0x14a5   :  { %2545 = vsyncpa [#allocation14], 1 }
0x14a6   :  { %2546 = vsyncpa [#allocation6], 1 }
0x14a7   :  { %2548 = vsyncpa [#allocation6 + $0x1], 1 }

</bundles_post_ra>
